<compile_context>
chip_gen: v6e
topology: v6e:2x2x1
jax: 0.10.0
libtpu: 0.0.40
codegen_flags: <defaults>
</compile_context>

<pallas_src>
import jax
import jax.numpy as jnp
from jax import lax
from jax.experimental import pallas as pl
from jax.experimental.pallas import tpu as pltpu

# ----------------------------- hyper-parameters ------------------------------
DIM_GRAPH_NODE = 6        # params.dim_graph_node (raw node feature dim)
DIM_EMBED_LID  = 10       # params.dim_embed_lid
DIM_EMBED_LOC  = 32       # params.dim_embed_loc
NUM_GNN_LAYER  = 2        # params.num_gnn_layer
DROPOUT_P      = 0.0      # params.dropout  (0.0 -> identity)
RELU_TYPE      = "relu"   # params.type_relu_gnn
ID_CONTAINED   = True     # params.graph_id_contained
LID_SIZE       = 64       # params.lid_size
TRACT_SIZE     = 32       # params.tract_size
BN_EPS         = 1e-5

NODE_TYPES = ("cell", "tract")
# (src, rel, dst); HeteroConv builds one SAGEConv per edge type.
EDGE_TYPES = (("cell", "flow", "cell"),
              ("tract", "spa", "cell"),
              ("cell", "spa", "tract"))


# ------------------------------ fused Pallas kernel --------------------------
def _bn_relu(x, gamma, beta):
    """Training-mode BatchNorm1d over the node axis (biased variance) + ReLU.

    mean and E[x^2] are independent reductions (no serialized sub/square chain);
    var = E[x^2] - mean^2.
    """
    mean = jnp.mean(x, axis=0, keepdims=True)
    mean_sq = jnp.mean(x * x, axis=0, keepdims=True)
    var = mean_sq - mean * mean
    y = (x - mean) * lax.rsqrt(var + BN_EPS) * gamma + beta
    if RELU_TYPE == "leaky":
        return jnp.where(y > 0, y, 0.01 * y)
    return jnp.maximum(y, 0.0)


def _fused_gnn_kernel(xc_ref, xt_ref,                     # [1,Nc,F] / [1,Nt,F]
                      a_flow_ref, a_tc_ref, a_ct_ref,     # per-graph mean-adjacency
                      projw_ref,                          # [2,F,D] projection weights
                      bias_ref,                           # [Nc+Nt,D] id-fold biases
                      w_ref,                              # [5*L,D,D] conv weight slab
                      bn_ref,                             # [L,4,1,D] BN gamma/beta slab
                      out_ref):                           # [1,Nc,D]
    nc = xc_ref.shape[1]

    xc = xc_ref[0]          # [Nc, F]
    xt = xt_ref[0]          # [Nt, F]
    a_flow = a_flow_ref[0]  # [Nc, Nc]
    a_tc = a_tc_ref[0]      # [Nc, Nt]
    a_ct = a_ct_ref[0]      # [Nt, Nc]

    bias_all = bias_ref[...]        # [Nc+Nt, D]
    bias_c = bias_all[:nc]
    bias_t = bias_all[nc:]

    # Per-node-type input projection. Id-embedding rows + Linear bias are folded
    # host-side into bias_c / bias_t, so K here is just the raw feature width.
    hc = jnp.dot(xc, projw_ref[0], preferred_element_type=jnp.float32) + bias_c
    ht = jnp.dot(xt, projw_ref[1], preferred_element_type=jnp.float32) + bias_t

    # Statically unrolled layer loop (NUM_GNN_LAYER == 2); all activations stay
    # in vregs/VMEM across the whole forward.
    for l in range(NUM_GNN_LAYER):
        base = 5 * l
        wl_flow = w_ref[base + 0]   # lin_l, cell -flow-> cell
        wl_spa  = w_ref[base + 1]   # lin_l, tract -spa-> cell
        wr_c    = w_ref[base + 2]   # summed lin_r for dst='cell'
        wl_t    = w_ref[base + 3]   # lin_l, cell -spa-> tract
        wr_t    = w_ref[base + 4]   # lin_r for dst='tract'

        # dst = 'cell': HeteroConv 'sum' of the two incoming edge types.
        # Two dots + add (no lane-axis concat); tract path weighted before
        # aggregation since Nt < D. lin_l biases omitted (cancelled by BN).
        out_cell = (
            jnp.dot(jnp.dot(a_flow, hc, preferred_element_type=jnp.float32),
                    wl_flow, preferred_element_type=jnp.float32)
            + jnp.dot(a_tc,
                      jnp.dot(ht, wl_spa, preferred_element_type=jnp.float32),
                      preferred_element_type=jnp.float32)
            + jnp.dot(hc, wr_c, preferred_element_type=jnp.float32))

        # dst = 'tract': single incoming edge type.
        out_tract = (
            jnp.dot(jnp.dot(a_ct, hc, preferred_element_type=jnp.float32),
                    wl_t, preferred_element_type=jnp.float32)
            + jnp.dot(ht, wr_t, preferred_element_type=jnp.float32))

        # BatchNorm (training-mode batch stats) + ReLU; F.dropout(p=0) == id.
        hc = _bn_relu(out_cell, bn_ref[l, 0], bn_ref[l, 1])
        ht = _bn_relu(out_tract, bn_ref[l, 2], bn_ref[l, 3])

    out_ref[0] = hc


# ------------------------------ parameter init -------------------------------
def _lin_init(key, d_in, d_out, bias=True):
    kw, kb = jax.random.split(key)
    bound = 1.0 / float(jnp.sqrt(float(d_in)))
    w = jax.random.uniform(kw, (d_out, d_in), jnp.float32, -bound, bound)  # torch layout
    b = (jax.random.uniform(kb, (1, d_out), jnp.float32, -bound, bound)
         if bias else jnp.zeros((1, d_out), jnp.float32))
    return {"w_t": w.T, "b": b}


def init_params(key):
    keys = jax.random.split(key, 4)
    p = {}
    # id_embedder['cell'] = Embedding(lid_size+3, dim_embed_lid, padding_idx=0)
    cell_tbl = 0.02 * jax.random.normal(keys[0], (LID_SIZE + 3, DIM_EMBED_LID), jnp.float32)
    p["id_cell"] = cell_tbl.at[0].set(0.0)
    # id_embedder['tract'] = Embedding(tract_size, dim_embed_lid)
    p["id_tract"] = 0.02 * jax.random.normal(keys[1], (TRACT_SIZE, DIM_EMBED_LID), jnp.float32)

    dim_node_raw = DIM_EMBED_LID + DIM_GRAPH_NODE if ID_CONTAINED else DIM_GRAPH_NODE
    tkeys = jax.random.split(keys[2], len(NODE_TYPES))
    p["transformer"] = {nt: _lin_init(tkeys[i], dim_node_raw, DIM_EMBED_LOC)
                        for i, nt in enumerate(NODE_TYPES)}

    p["convs"] = []
    lkeys = jax.random.split(keys[3], NUM_GNN_LAYER)
    for l in range(NUM_GNN_LAYER):
        ekeys = jax.random.split(lkeys[l], len(EDGE_TYPES))
        layer = {}
        for i, et in enumerate(EDGE_TYPES):
            kl, kr = jax.random.split(ekeys[i])
            lin_l = _lin_init(kl, DIM_EMBED_LOC, DIM_EMBED_LOC, bias=True)   # lin_l (bias)
            lin_r = _lin_init(kr, DIM_EMBED_LOC, DIM_EMBED_LOC, bias=False)  # lin_r (no bias)
            layer[et] = {"wl_t": lin_l["w_t"], "bl": lin_l["b"], "wr_t": lin_r["w_t"]}
        p["convs"].append(layer)

    p["norms"] = {nt: [{"gamma": jnp.ones((1, DIM_EMBED_LOC), jnp.float32),
                        "beta": jnp.zeros((1, DIM_EMBED_LOC), jnp.float32)}
                       for _ in range(NUM_GNN_LAYER)]
                  for nt in NODE_TYPES}
    return p


# --------------------------------- glue ops ----------------------------------
def mean_adj(edge_index, n_src, n_dst):
    """Dense mean-aggregation operator: A[i, j] = (#edges j->i) / in_degree(i).

    Built once per graph with an XLA scatter-add (irregular, HBM-bound);
    deliberately kept out of the fused Pallas kernel.
    """
    src, dst = edge_index[0], edge_index[1]
    a = jnp.zeros((n_dst, n_src), jnp.float32).at[dst, src].add(1.0)
    deg = a.sum(axis=1, keepdims=True)
    return a / jnp.maximum(deg, 1.0)


# ------------------------------ forward (module) -----------------------------
def gnn_embedder_forward(params, n_nodes, x_batch, adj_batch):
    """Batched forward: G independent graphs, one grid step per graph.

    x_batch  : {"cell": [G,Nc,F], "tract": [G,Nt,F]}
    adj_batch: {"flow": [G,Nc,Nc], "tc": [G,Nc,Nt], "ct": [G,Nt,Nc]}
    """
    nc, nt = n_nodes["cell"], n_nodes["tract"]
    G = x_batch["cell"].shape[0]
    F_raw = DIM_GRAPH_NODE
    D = DIM_EMBED_LOC
    L = NUM_GNN_LAYER

    # --- host-side algebraic folding -----------------------------------------
    # Input projection: x_raw @ W_raw + (id_tbl[:N] @ W_id + b). Id rows are a
    # constant slice of the embedding table (indices arange(N)), so they fold
    # into a per-node additive bias shared by every graph in the batch.
    proj_w, biases = [], []
    for node in NODE_TYPES:
        w_t = params["transformer"][node]["w_t"]              # [dim_raw, D]
        b = params["transformer"][node]["b"]                  # [1, D]
        n = n_nodes[node]
        if ID_CONTAINED:
            w_raw_t = w_t[:DIM_GRAPH_NODE]
            w_id_t = w_t[DIM_GRAPH_NODE:]
            id_tbl = params["id_cell"] if node == "cell" else params["id_tract"]
            bias = id_tbl[:n] @ w_id_t + b                    # [n, D]
        else:
            w_raw_t = w_t
            bias = jnp.broadcast_to(b, (n, D))
        proj_w.append(w_raw_t)
        biases.append(bias)
    proj_w = jnp.stack(proj_w)                                # [2, F, D]
    bias_slab = jnp.concatenate(biases, axis=0)               # [Nc+Nt, D]

    # Conv-weight slab: 5 DxD matrices per layer.
    # lin_l biases are intentionally dropped: training-mode BN over the node
    # axis cancels any constant per-feature addition exactly.
    w_rows = []
    for l in range(L):
        cf = params["convs"][l][EDGE_TYPES[0]]   # cell -flow-> cell
        cs = params["convs"][l][EDGE_TYPES[1]]   # tract -spa-> cell
        ct = params["convs"][l][EDGE_TYPES[2]]   # cell -spa-> tract
        w_rows += [cf["wl_t"], cs["wl_t"], cf["wr_t"] + cs["wr_t"],
                   ct["wl_t"], ct["wr_t"]]
    w_slab = jnp.stack(w_rows)                                # [5L, D, D]

    # BN slab: [L, 4, 1, D] = (gamma_cell, beta_cell, gamma_tract, beta_tract).
    bn_slab = jnp.stack([
        jnp.stack([params["norms"]["cell"][l]["gamma"],
                   params["norms"]["cell"][l]["beta"],
                   params["norms"]["tract"][l]["gamma"],
                   params["norms"]["tract"][l]["beta"]])
        for l in range(L)])

    return pl.pallas_call(
        _fused_gnn_kernel,
        out_shape=jax.ShapeDtypeStruct((G, nc, D), jnp.float32),
        grid_spec=pltpu.PrefetchScalarGridSpec(
            num_scalar_prefetch=0,
            grid=(G,),
            in_specs=[
                # per-graph blocks
                pl.BlockSpec((1, nc, F_raw), lambda g: (g, 0, 0)),
                pl.BlockSpec((1, nt, F_raw), lambda g: (g, 0, 0)),
                pl.BlockSpec((1, nc, nc), lambda g: (g, 0, 0)),
                pl.BlockSpec((1, nc, nt), lambda g: (g, 0, 0)),
                pl.BlockSpec((1, nt, nc), lambda g: (g, 0, 0)),
                # shared parameter slabs (constant block across the grid)
                pl.BlockSpec((2, F_raw, D), lambda g: (0, 0, 0)),
                pl.BlockSpec((nc + nt, D), lambda g: (0, 0)),
                pl.BlockSpec((5 * L, D, D), lambda g: (0, 0, 0)),
                pl.BlockSpec((L, 4, 1, D), lambda g: (0, 0, 0, 0)),
            ],
            out_specs=pl.BlockSpec((1, nc, D), lambda g: (g, 0, 0)),
        ),
        compiler_params=pltpu.CompilerParams(
            dimension_semantics=("parallel",)),
    )(x_batch["cell"], x_batch["tract"],
      adj_batch["flow"], adj_batch["tc"], adj_batch["ct"],
      proj_w, bias_slab, w_slab, bn_slab)


# --------------------------- pure-JAX reference -------------------------------
def reference_forward(params, n_nodes, x_dict, edge_index_dict):
    """Unfused single-graph reference mirroring the PyTorch module."""
    x = dict(x_dict)
    if ID_CONTAINED:
        x["cell"] = jnp.concatenate([x["cell"], params["id_cell"][: n_nodes["cell"]]], axis=1)
        x["tract"] = jnp.concatenate([x["tract"], params["id_tract"][: n_nodes["tract"]]], axis=1)
    x = {nt: x[nt] @ params["transformer"][nt]["w_t"] + params["transformer"][nt]["b"]
         for nt in NODE_TYPES}
    adjs = {et: mean_adj(edge_index_dict[et], n_nodes[et[0]], n_nodes[et[2]])
            for et in EDGE_TYPES}
    for layer in range(NUM_GNN_LAYER):
        out = {nt: jnp.zeros((n_nodes[nt], DIM_EMBED_LOC), jnp.float32) for nt in NODE_TYPES}
        for et in EDGE_TYPES:
            s, _, d = et
            w = params["convs"][layer][et]
            agg = adjs[et] @ x[s]
            out[d] = out[d] + agg @ w["wl_t"] + w["bl"] + x[d] @ w["wr_t"]
        new_x = {}
        for ntp in NODE_TYPES:
            bn = params["norms"][ntp][layer]
            h = out[ntp]
            mean = jnp.mean(h, axis=0, keepdims=True)
            var = jnp.mean((h - mean) ** 2, axis=0, keepdims=True)
            y = (h - mean) * lax.rsqrt(var + BN_EPS) * bn["gamma"] + bn["beta"]
            new_x[ntp] = jnp.where(y > 0, y, 0.01 * y) if RELU_TYPE == "leaky" \
                else jnp.maximum(y, 0.0)
        x = new_x
    return x["cell"]


# ----------------------------------- main -------------------------------------
def make_batch(key, num_graphs):
    n_nodes = {"cell": 24, "tract": 8}
    xs_c, xs_t = [], []
    a_flow, a_tc, a_ct = [], [], []
    edge_index_dicts = []

    def rand_edges(k, ns, nd, ne):
        ks, kd = jax.random.split(k)
        src = jax.random.randint(ks, (ne,), 0, ns, dtype=jnp.int32)
        dst = jax.random.randint(kd, (ne,), 0, nd, dtype=jnp.int32)
        return jnp.stack([src, dst])

    for kg in jax.random.split(key, num_graphs):
        kx1, kx2, ke1, ke2, ke3 = jax.random.split(kg, 5)
        xs_c.append(jax.random.normal(kx1, (n_nodes["cell"], DIM_GRAPH_NODE), jnp.float32))
        xs_t.append(jax.random.normal(kx2, (n_nodes["tract"], DIM_GRAPH_NODE), jnp.float32))
        eid = {
            EDGE_TYPES[0]: rand_edges(ke1, n_nodes["cell"], n_nodes["cell"], 48),
            EDGE_TYPES[1]: rand_edges(ke2, n_nodes["tract"], n_nodes["cell"], 32),
            EDGE_TYPES[2]: rand_edges(ke3, n_nodes["cell"], n_nodes["tract"], 32),
        }
        edge_index_dicts.append(eid)
        a_flow.append(mean_adj(eid[EDGE_TYPES[0]], n_nodes["cell"], n_nodes["cell"]))
        a_tc.append(mean_adj(eid[EDGE_TYPES[1]], n_nodes["tract"], n_nodes["cell"]))
        a_ct.append(mean_adj(eid[EDGE_TYPES[2]], n_nodes["cell"], n_nodes["tract"]))

    x_batch = {"cell": jnp.stack(xs_c), "tract": jnp.stack(xs_t)}
    adj_batch = {"flow": jnp.stack(a_flow), "tc": jnp.stack(a_tc), "ct": jnp.stack(a_ct)}
    return n_nodes, x_batch, adj_batch, edge_index_dicts


if __name__ == "__main__":
    root = jax.random.PRNGKey(0)
    k_params, k_graph = jax.random.split(root)
    params = init_params(k_params)

    NUM_GRAPHS = 4
    n_nodes, x_batch, adj_batch, edge_index_dicts = make_batch(k_graph, NUM_GRAPHS)

    out = gnn_embedder_forward(params, n_nodes, x_batch, adj_batch)
    out = jax.block_until_ready(out)
    assert out.shape == (NUM_GRAPHS, n_nodes["cell"], DIM_EMBED_LOC), out.shape
    assert bool(jnp.all(jnp.isfinite(out)))

    # correctness check against the unfused pure-JAX reference, per graph
    max_err = 0.0
    for g in range(NUM_GRAPHS):
        x_dict = {"cell": x_batch["cell"][g], "tract": x_batch["tract"][g]}
        ref = jax.block_until_ready(
            reference_forward(params, n_nodes, x_dict, edge_index_dicts[g]))
        max_err = max(max_err, float(jnp.max(jnp.abs(out[g] - ref))))
    assert max_err < 1e-3, f"mismatch vs reference: {max_err}"

    print("KERNEL_OK")
</pallas_src>

<mosaic_0001>
module attributes {stable_mosaic.version = 11 : i64} {
  func.func @_fused_gnn_kernel(%arg0: i32, %arg1: memref<1x24x6xf32, #tpu.memory_space<vmem>>, %arg2: memref<1x8x6xf32, #tpu.memory_space<vmem>>, %arg3: memref<1x24x24xf32, #tpu.memory_space<vmem>>, %arg4: memref<1x24x8xf32, #tpu.memory_space<vmem>>, %arg5: memref<1x8x24xf32, #tpu.memory_space<vmem>>, %arg6: memref<2x6x32xf32, #tpu.memory_space<vmem>>, %arg7: memref<32x32xf32, #tpu.memory_space<vmem>>, %arg8: memref<10x32x32xf32, #tpu.memory_space<vmem>>, %arg9: memref<2x4x1x32xf32, #tpu.memory_space<vmem>>, %arg10: memref<1x24x32xf32, #tpu.memory_space<vmem>>) attributes {dimension_semantics = [#tpu.dimension_semantics<parallel>], iteration_bounds = array<i64: 4>, scalar_prefetch = 0 : i64, scratch_operands = 0 : i64, tpu.core_type = #tpu.core_type<tc>, window_params = [{transform_indices = @transform_0, window_bounds = array<i64: 1, 24, 6>}, {transform_indices = @transform_1, window_bounds = array<i64: 1, 8, 6>}, {transform_indices = @transform_2, window_bounds = array<i64: 1, 24, 24>}, {transform_indices = @transform_3, window_bounds = array<i64: 1, 24, 8>}, {transform_indices = @transform_4, window_bounds = array<i64: 1, 8, 24>}, {pipeline_mode = #tpu.pipeline_mode<synchronous>, transform_indices = @transform_5, window_bounds = array<i64: 2, 6, 32>}, {pipeline_mode = #tpu.pipeline_mode<synchronous>, transform_indices = @transform_6, window_bounds = array<i64: 32, 32>}, {pipeline_mode = #tpu.pipeline_mode<synchronous>, transform_indices = @transform_7, window_bounds = array<i64: 10, 32, 32>}, {pipeline_mode = #tpu.pipeline_mode<synchronous>, transform_indices = @transform_8, window_bounds = array<i64: 2, 4, 1, 32>}, {transform_indices = @transform_9, window_bounds = array<i64: 1, 24, 32>}]} {
    %c0 = arith.constant 0 : index
    %c0_0 = arith.constant 0 : index
    %c0_1 = arith.constant 0 : index
    %0 = vector.load %arg1[%c0, %c0_0, %c0_1] : memref<1x24x6xf32, #tpu.memory_space<vmem>>, vector<1x24x6xf32>
    %1 = vector.shape_cast %0 : vector<1x24x6xf32> to vector<24x6xf32>
    %c0_2 = arith.constant 0 : index
    %c0_3 = arith.constant 0 : index
    %c0_4 = arith.constant 0 : index
    %2 = vector.load %arg2[%c0_2, %c0_3, %c0_4] : memref<1x8x6xf32, #tpu.memory_space<vmem>>, vector<1x8x6xf32>
    %3 = vector.shape_cast %2 : vector<1x8x6xf32> to vector<8x6xf32>
    %c0_5 = arith.constant 0 : index
    %c0_6 = arith.constant 0 : index
    %c0_7 = arith.constant 0 : index
    %4 = vector.load %arg3[%c0_5, %c0_6, %c0_7] : memref<1x24x24xf32, #tpu.memory_space<vmem>>, vector<1x24x24xf32>
    %5 = vector.shape_cast %4 : vector<1x24x24xf32> to vector<24x24xf32>
    %c0_8 = arith.constant 0 : index
    %c0_9 = arith.constant 0 : index
    %c0_10 = arith.constant 0 : index
    %6 = vector.load %arg4[%c0_8, %c0_9, %c0_10] : memref<1x24x8xf32, #tpu.memory_space<vmem>>, vector<1x24x8xf32>
    %7 = vector.shape_cast %6 : vector<1x24x8xf32> to vector<24x8xf32>
    %c0_11 = arith.constant 0 : index
    %c0_12 = arith.constant 0 : index
    %c0_13 = arith.constant 0 : index
    %8 = vector.load %arg5[%c0_11, %c0_12, %c0_13] : memref<1x8x24xf32, #tpu.memory_space<vmem>>, vector<1x8x24xf32>
    %9 = vector.shape_cast %8 : vector<1x8x24xf32> to vector<8x24xf32>
    %c0_14 = arith.constant 0 : index
    %c0_15 = arith.constant 0 : index
    %10 = vector.load %arg7[%c0_14, %c0_15] : memref<32x32xf32, #tpu.memory_space<vmem>>, vector<32x32xf32>
    %11 = vector.extract_strided_slice %10 {offsets = [0, 0], sizes = [24, 32], strides = [1, 1]} : vector<32x32xf32> to vector<24x32xf32>
    %12 = vector.extract_strided_slice %10 {offsets = [24, 0], sizes = [8, 32], strides = [1, 1]} : vector<32x32xf32> to vector<8x32xf32>
    %c0_16 = arith.constant 0 : index
    %c0_17 = arith.constant 0 : index
    %c0_18 = arith.constant 0 : index
    %13 = vector.load %arg6[%c0_16, %c0_17, %c0_18] : memref<2x6x32xf32, #tpu.memory_space<vmem>>, vector<1x6x32xf32>
    %14 = vector.shape_cast %13 : vector<1x6x32xf32> to vector<6x32xf32>
    %cst = arith.constant dense<0.000000e+00> : vector<24x32xf32>
    %15 = tpu.matmul %1, %14, %cst {dimension_numbers = #tpu.dot_dimension_numbers<[1], [0], [0], [1], [0, 0, 1, 1], [], []>} : vector<24x6xf32>, vector<6x32xf32>, vector<24x32xf32> -> vector<24x32xf32>
    %16 = arith.addf %15, %11 : vector<24x32xf32>
    %c1 = arith.constant 1 : index
    %c0_19 = arith.constant 0 : index
    %c0_20 = arith.constant 0 : index
    %17 = vector.load %arg6[%c1, %c0_19, %c0_20] : memref<2x6x32xf32, #tpu.memory_space<vmem>>, vector<1x6x32xf32>
    %18 = vector.shape_cast %17 : vector<1x6x32xf32> to vector<6x32xf32>
    %cst_21 = arith.constant dense<0.000000e+00> : vector<8x32xf32>
    %19 = tpu.matmul %3, %18, %cst_21 {dimension_numbers = #tpu.dot_dimension_numbers<[1], [0], [0], [1], [0, 0, 1, 1], [], []>} : vector<8x6xf32>, vector<6x32xf32>, vector<8x32xf32> -> vector<8x32xf32>
    %20 = arith.addf %19, %12 : vector<8x32xf32>
    %c0_22 = arith.constant 0 : index
    %c0_23 = arith.constant 0 : index
    %c0_24 = arith.constant 0 : index
    %21 = vector.load %arg8[%c0_22, %c0_23, %c0_24] : memref<10x32x32xf32, #tpu.memory_space<vmem>>, vector<1x32x32xf32>
    %22 = vector.shape_cast %21 : vector<1x32x32xf32> to vector<32x32xf32>
    %c1_25 = arith.constant 1 : index
    %c0_26 = arith.constant 0 : index
    %c0_27 = arith.constant 0 : index
    %23 = vector.load %arg8[%c1_25, %c0_26, %c0_27] : memref<10x32x32xf32, #tpu.memory_space<vmem>>, vector<1x32x32xf32>
    %24 = vector.shape_cast %23 : vector<1x32x32xf32> to vector<32x32xf32>
    %c2 = arith.constant 2 : index
    %c0_28 = arith.constant 0 : index
    %c0_29 = arith.constant 0 : index
    %25 = vector.load %arg8[%c2, %c0_28, %c0_29] : memref<10x32x32xf32, #tpu.memory_space<vmem>>, vector<1x32x32xf32>
    %26 = vector.shape_cast %25 : vector<1x32x32xf32> to vector<32x32xf32>
    %c3 = arith.constant 3 : index
    %c0_30 = arith.constant 0 : index
    %c0_31 = arith.constant 0 : index
    %27 = vector.load %arg8[%c3, %c0_30, %c0_31] : memref<10x32x32xf32, #tpu.memory_space<vmem>>, vector<1x32x32xf32>
    %28 = vector.shape_cast %27 : vector<1x32x32xf32> to vector<32x32xf32>
    %c4 = arith.constant 4 : index
    %c0_32 = arith.constant 0 : index
    %c0_33 = arith.constant 0 : index
    %29 = vector.load %arg8[%c4, %c0_32, %c0_33] : memref<10x32x32xf32, #tpu.memory_space<vmem>>, vector<1x32x32xf32>
    %30 = vector.shape_cast %29 : vector<1x32x32xf32> to vector<32x32xf32>
    %cst_34 = arith.constant dense<0.000000e+00> : vector<24x32xf32>
    %31 = tpu.matmul %5, %16, %cst_34 {dimension_numbers = #tpu.dot_dimension_numbers<[1], [0], [0], [1], [0, 0, 1, 1], [], []>} : vector<24x24xf32>, vector<24x32xf32>, vector<24x32xf32> -> vector<24x32xf32>
    %cst_35 = arith.constant dense<0.000000e+00> : vector<24x32xf32>
    %32 = tpu.matmul %31, %22, %cst_35 {dimension_numbers = #tpu.dot_dimension_numbers<[1], [0], [0], [1], [0, 0, 1, 1], [], []>} : vector<24x32xf32>, vector<32x32xf32>, vector<24x32xf32> -> vector<24x32xf32>
    %cst_36 = arith.constant dense<0.000000e+00> : vector<8x32xf32>
    %33 = tpu.matmul %20, %24, %cst_36 {dimension_numbers = #tpu.dot_dimension_numbers<[1], [0], [0], [1], [0, 0, 1, 1], [], []>} : vector<8x32xf32>, vector<32x32xf32>, vector<8x32xf32> -> vector<8x32xf32>
    %cst_37 = arith.constant dense<0.000000e+00> : vector<24x32xf32>
    %34 = tpu.matmul %7, %33, %cst_37 {dimension_numbers = #tpu.dot_dimension_numbers<[1], [0], [0], [1], [0, 0, 1, 1], [], []>} : vector<24x8xf32>, vector<8x32xf32>, vector<24x32xf32> -> vector<24x32xf32>
    %35 = arith.addf %32, %34 : vector<24x32xf32>
    %cst_38 = arith.constant dense<0.000000e+00> : vector<24x32xf32>
    %36 = tpu.matmul %16, %26, %cst_38 {dimension_numbers = #tpu.dot_dimension_numbers<[1], [0], [0], [1], [0, 0, 1, 1], [], []>} : vector<24x32xf32>, vector<32x32xf32>, vector<24x32xf32> -> vector<24x32xf32>
    %37 = arith.addf %35, %36 : vector<24x32xf32>
    %cst_39 = arith.constant dense<0.000000e+00> : vector<8x32xf32>
    %38 = tpu.matmul %9, %16, %cst_39 {dimension_numbers = #tpu.dot_dimension_numbers<[1], [0], [0], [1], [0, 0, 1, 1], [], []>} : vector<8x24xf32>, vector<24x32xf32>, vector<8x32xf32> -> vector<8x32xf32>
    %cst_40 = arith.constant dense<0.000000e+00> : vector<8x32xf32>
    %39 = tpu.matmul %38, %28, %cst_40 {dimension_numbers = #tpu.dot_dimension_numbers<[1], [0], [0], [1], [0, 0, 1, 1], [], []>} : vector<8x32xf32>, vector<32x32xf32>, vector<8x32xf32> -> vector<8x32xf32>
    %cst_41 = arith.constant dense<0.000000e+00> : vector<8x32xf32>
    %40 = tpu.matmul %20, %30, %cst_41 {dimension_numbers = #tpu.dot_dimension_numbers<[1], [0], [0], [1], [0, 0, 1, 1], [], []>} : vector<8x32xf32>, vector<32x32xf32>, vector<8x32xf32> -> vector<8x32xf32>
    %41 = arith.addf %39, %40 : vector<8x32xf32>
    %c0_42 = arith.constant 0 : index
    %c0_43 = arith.constant 0 : index
    %c0_44 = arith.constant 0 : index
    %c0_45 = arith.constant 0 : index
    %42 = vector.load %arg9[%c0_42, %c0_43, %c0_44, %c0_45] : memref<2x4x1x32xf32, #tpu.memory_space<vmem>>, vector<1x1x1x32xf32>
    %43 = vector.shape_cast %42 : vector<1x1x1x32xf32> to vector<1x32xf32>
    %c0_46 = arith.constant 0 : index
    %c1_47 = arith.constant 1 : index
    %c0_48 = arith.constant 0 : index
    %c0_49 = arith.constant 0 : index
    %44 = vector.load %arg9[%c0_46, %c1_47, %c0_48, %c0_49] : memref<2x4x1x32xf32, #tpu.memory_space<vmem>>, vector<1x1x1x32xf32>
    %45 = vector.shape_cast %44 : vector<1x1x1x32xf32> to vector<1x32xf32>
    %cst_50 = arith.constant dense<0.000000e+00> : vector<32xf32>
    %46 = vector.multi_reduction <add>, %37, %cst_50 [0] : vector<24x32xf32> to vector<32xf32>
    %47 = vector.shape_cast %46 : vector<32xf32> to vector<1x32xf32>
    %cst_51 = arith.constant 2.400000e+01 : f32
    %48 = vector.broadcast %cst_51 : f32 to vector<1x32xf32>
    %49 = arith.divf %47, %48 : vector<1x32xf32>
    %50 = arith.mulf %37, %37 : vector<24x32xf32>
    %cst_52 = arith.constant dense<0.000000e+00> : vector<32xf32>
    %51 = vector.multi_reduction <add>, %50, %cst_52 [0] : vector<24x32xf32> to vector<32xf32>
    %52 = vector.shape_cast %51 : vector<32xf32> to vector<1x32xf32>
    %cst_53 = arith.constant 2.400000e+01 : f32
    %53 = vector.broadcast %cst_53 : f32 to vector<1x32xf32>
    %54 = arith.divf %52, %53 : vector<1x32xf32>
    %55 = arith.mulf %49, %49 : vector<1x32xf32>
    %56 = arith.subf %54, %55 : vector<1x32xf32>
    %57 = vector.broadcast %49 : vector<1x32xf32> to vector<24x32xf32>
    %58 = arith.subf %37, %57 : vector<24x32xf32>
    %cst_54 = arith.constant 9.99999974E-6 : f32
    %59 = vector.broadcast %cst_54 : f32 to vector<1x32xf32>
    %60 = arith.addf %56, %59 : vector<1x32xf32>
    %61 = math.rsqrt %60 : vector<1x32xf32>
    %62 = vector.broadcast %61 : vector<1x32xf32> to vector<24x32xf32>
    %63 = arith.mulf %58, %62 : vector<24x32xf32>
    %64 = vector.broadcast %43 : vector<1x32xf32> to vector<24x32xf32>
    %65 = arith.mulf %63, %64 : vector<24x32xf32>
    %66 = vector.broadcast %45 : vector<1x32xf32> to vector<24x32xf32>
    %67 = arith.addf %65, %66 : vector<24x32xf32>
    %cst_55 = arith.constant 0.000000e+00 : f32
    %68 = vector.broadcast %cst_55 : f32 to vector<24x32xf32>
    %69 = arith.maximumf %67, %68 : vector<24x32xf32>
    %c0_56 = arith.constant 0 : index
    %c2_57 = arith.constant 2 : index
    %c0_58 = arith.constant 0 : index
    %c0_59 = arith.constant 0 : index
    %70 = vector.load %arg9[%c0_56, %c2_57, %c0_58, %c0_59] : memref<2x4x1x32xf32, #tpu.memory_space<vmem>>, vector<1x1x1x32xf32>
    %71 = vector.shape_cast %70 : vector<1x1x1x32xf32> to vector<1x32xf32>
    %c0_60 = arith.constant 0 : index
    %c3_61 = arith.constant 3 : index
    %c0_62 = arith.constant 0 : index
    %c0_63 = arith.constant 0 : index
    %72 = vector.load %arg9[%c0_60, %c3_61, %c0_62, %c0_63] : memref<2x4x1x32xf32, #tpu.memory_space<vmem>>, vector<1x1x1x32xf32>
    %73 = vector.shape_cast %72 : vector<1x1x1x32xf32> to vector<1x32xf32>
    %cst_64 = arith.constant dense<0.000000e+00> : vector<32xf32>
    %74 = vector.multi_reduction <add>, %41, %cst_64 [0] : vector<8x32xf32> to vector<32xf32>
    %75 = vector.shape_cast %74 : vector<32xf32> to vector<1x32xf32>
    %cst_65 = arith.constant 8.000000e+00 : f32
    %76 = vector.broadcast %cst_65 : f32 to vector<1x32xf32>
    %77 = arith.divf %75, %76 : vector<1x32xf32>
    %78 = arith.mulf %41, %41 : vector<8x32xf32>
    %cst_66 = arith.constant dense<0.000000e+00> : vector<32xf32>
    %79 = vector.multi_reduction <add>, %78, %cst_66 [0] : vector<8x32xf32> to vector<32xf32>
    %80 = vector.shape_cast %79 : vector<32xf32> to vector<1x32xf32>
    %cst_67 = arith.constant 8.000000e+00 : f32
    %81 = vector.broadcast %cst_67 : f32 to vector<1x32xf32>
    %82 = arith.divf %80, %81 : vector<1x32xf32>
    %83 = arith.mulf %77, %77 : vector<1x32xf32>
    %84 = arith.subf %82, %83 : vector<1x32xf32>
    %85 = vector.broadcast %77 : vector<1x32xf32> to vector<8x32xf32>
    %86 = arith.subf %41, %85 : vector<8x32xf32>
    %cst_68 = arith.constant 9.99999974E-6 : f32
    %87 = vector.broadcast %cst_68 : f32 to vector<1x32xf32>
    %88 = arith.addf %84, %87 : vector<1x32xf32>
    %89 = math.rsqrt %88 : vector<1x32xf32>
    %90 = vector.broadcast %89 : vector<1x32xf32> to vector<8x32xf32>
    %91 = arith.mulf %86, %90 : vector<8x32xf32>
    %92 = vector.broadcast %71 : vector<1x32xf32> to vector<8x32xf32>
    %93 = arith.mulf %91, %92 : vector<8x32xf32>
    %94 = vector.broadcast %73 : vector<1x32xf32> to vector<8x32xf32>
    %95 = arith.addf %93, %94 : vector<8x32xf32>
    %cst_69 = arith.constant 0.000000e+00 : f32
    %96 = vector.broadcast %cst_69 : f32 to vector<8x32xf32>
    %97 = arith.maximumf %95, %96 : vector<8x32xf32>
    %c5 = arith.constant 5 : index
    %c0_70 = arith.constant 0 : index
    %c0_71 = arith.constant 0 : index
    %98 = vector.load %arg8[%c5, %c0_70, %c0_71] : memref<10x32x32xf32, #tpu.memory_space<vmem>>, vector<1x32x32xf32>
    %99 = vector.shape_cast %98 : vector<1x32x32xf32> to vector<32x32xf32>
    %c6 = arith.constant 6 : index
    %c0_72 = arith.constant 0 : index
    %c0_73 = arith.constant 0 : index
    %100 = vector.load %arg8[%c6, %c0_72, %c0_73] : memref<10x32x32xf32, #tpu.memory_space<vmem>>, vector<1x32x32xf32>
    %101 = vector.shape_cast %100 : vector<1x32x32xf32> to vector<32x32xf32>
    %c7 = arith.constant 7 : index
    %c0_74 = arith.constant 0 : index
    %c0_75 = arith.constant 0 : index
    %102 = vector.load %arg8[%c7, %c0_74, %c0_75] : memref<10x32x32xf32, #tpu.memory_space<vmem>>, vector<1x32x32xf32>
    %103 = vector.shape_cast %102 : vector<1x32x32xf32> to vector<32x32xf32>
    %cst_76 = arith.constant dense<0.000000e+00> : vector<24x32xf32>
    %104 = tpu.matmul %5, %69, %cst_76 {dimension_numbers = #tpu.dot_dimension_numbers<[1], [0], [0], [1], [0, 0, 1, 1], [], []>} : vector<24x24xf32>, vector<24x32xf32>, vector<24x32xf32> -> vector<24x32xf32>
    %cst_77 = arith.constant dense<0.000000e+00> : vector<24x32xf32>
    %105 = tpu.matmul %104, %99, %cst_77 {dimension_numbers = #tpu.dot_dimension_numbers<[1], [0], [0], [1], [0, 0, 1, 1], [], []>} : vector<24x32xf32>, vector<32x32xf32>, vector<24x32xf32> -> vector<24x32xf32>
    %cst_78 = arith.constant dense<0.000000e+00> : vector<8x32xf32>
    %106 = tpu.matmul %97, %101, %cst_78 {dimension_numbers = #tpu.dot_dimension_numbers<[1], [0], [0], [1], [0, 0, 1, 1], [], []>} : vector<8x32xf32>, vector<32x32xf32>, vector<8x32xf32> -> vector<8x32xf32>
    %cst_79 = arith.constant dense<0.000000e+00> : vector<24x32xf32>
    %107 = tpu.matmul %7, %106, %cst_79 {dimension_numbers = #tpu.dot_dimension_numbers<[1], [0], [0], [1], [0, 0, 1, 1], [], []>} : vector<24x8xf32>, vector<8x32xf32>, vector<24x32xf32> -> vector<24x32xf32>
    %108 = arith.addf %105, %107 : vector<24x32xf32>
    %cst_80 = arith.constant dense<0.000000e+00> : vector<24x32xf32>
    %109 = tpu.matmul %69, %103, %cst_80 {dimension_numbers = #tpu.dot_dimension_numbers<[1], [0], [0], [1], [0, 0, 1, 1], [], []>} : vector<24x32xf32>, vector<32x32xf32>, vector<24x32xf32> -> vector<24x32xf32>
    %110 = arith.addf %108, %109 : vector<24x32xf32>
    %c1_81 = arith.constant 1 : index
    %c0_82 = arith.constant 0 : index
    %c0_83 = arith.constant 0 : index
    %c0_84 = arith.constant 0 : index
    %111 = vector.load %arg9[%c1_81, %c0_82, %c0_83, %c0_84] : memref<2x4x1x32xf32, #tpu.memory_space<vmem>>, vector<1x1x1x32xf32>
    %112 = vector.shape_cast %111 : vector<1x1x1x32xf32> to vector<1x32xf32>
    %c1_85 = arith.constant 1 : index
    %c1_86 = arith.constant 1 : index
    %c0_87 = arith.constant 0 : index
    %c0_88 = arith.constant 0 : index
    %113 = vector.load %arg9[%c1_85, %c1_86, %c0_87, %c0_88] : memref<2x4x1x32xf32, #tpu.memory_space<vmem>>, vector<1x1x1x32xf32>
    %114 = vector.shape_cast %113 : vector<1x1x1x32xf32> to vector<1x32xf32>
    %cst_89 = arith.constant dense<0.000000e+00> : vector<32xf32>
    %115 = vector.multi_reduction <add>, %110, %cst_89 [0] : vector<24x32xf32> to vector<32xf32>
    %116 = vector.shape_cast %115 : vector<32xf32> to vector<1x32xf32>
    %cst_90 = arith.constant 2.400000e+01 : f32
    %117 = vector.broadcast %cst_90 : f32 to vector<1x32xf32>
    %118 = arith.divf %116, %117 : vector<1x32xf32>
    %119 = arith.mulf %110, %110 : vector<24x32xf32>
    %cst_91 = arith.constant dense<0.000000e+00> : vector<32xf32>
    %120 = vector.multi_reduction <add>, %119, %cst_91 [0] : vector<24x32xf32> to vector<32xf32>
    %121 = vector.shape_cast %120 : vector<32xf32> to vector<1x32xf32>
    %cst_92 = arith.constant 2.400000e+01 : f32
    %122 = vector.broadcast %cst_92 : f32 to vector<1x32xf32>
    %123 = arith.divf %121, %122 : vector<1x32xf32>
    %124 = arith.mulf %118, %118 : vector<1x32xf32>
    %125 = arith.subf %123, %124 : vector<1x32xf32>
    %126 = vector.broadcast %118 : vector<1x32xf32> to vector<24x32xf32>
    %127 = arith.subf %110, %126 : vector<24x32xf32>
    %cst_93 = arith.constant 9.99999974E-6 : f32
    %128 = vector.broadcast %cst_93 : f32 to vector<1x32xf32>
    %129 = arith.addf %125, %128 : vector<1x32xf32>
    %130 = math.rsqrt %129 : vector<1x32xf32>
    %131 = vector.broadcast %130 : vector<1x32xf32> to vector<24x32xf32>
    %132 = arith.mulf %127, %131 : vector<24x32xf32>
    %133 = vector.broadcast %112 : vector<1x32xf32> to vector<24x32xf32>
    %134 = arith.mulf %132, %133 : vector<24x32xf32>
    %135 = vector.broadcast %114 : vector<1x32xf32> to vector<24x32xf32>
    %136 = arith.addf %134, %135 : vector<24x32xf32>
    %cst_94 = arith.constant 0.000000e+00 : f32
    %137 = vector.broadcast %cst_94 : f32 to vector<24x32xf32>
    %138 = arith.maximumf %136, %137 : vector<24x32xf32>
    %c0_95 = arith.constant 0 : index
    %c0_96 = arith.constant 0 : index
    %c0_97 = arith.constant 0 : index
    %139 = vector.load %arg10[%c0_95, %c0_96, %c0_97] : memref<1x24x32xf32, #tpu.memory_space<vmem>>, vector<1x24x32xf32>
    %140 = vector.shape_cast %139 : vector<1x24x32xf32> to vector<24x32xf32>
    %141 = vector.shape_cast %138 : vector<24x32xf32> to vector<1x24x32xf32>
    tpu.vector_store %arg10[%c0_95, %c0_96, %c0_97], %141 {strides = array<i32>} : memref<1x24x32xf32, #tpu.memory_space<vmem>>, vector<1x24x32xf32>,
    return
  }
  func.func @transform_0(%arg0: i32) -> (i32, i32, i32) {
    %c0_i32 = arith.constant 0 : i32
    %c0_i32_0 = arith.constant 0 : i32
    %c0_i32_1 = arith.constant 0 : i32
    return %arg0, %c0_i32, %c0_i32_0 : i32, i32, i32
  }
  func.func @transform_1(%arg0: i32) -> (i32, i32, i32) {
    %c0_i32 = arith.constant 0 : i32
    %c0_i32_0 = arith.constant 0 : i32
    %c0_i32_1 = arith.constant 0 : i32
    return %arg0, %c0_i32, %c0_i32_0 : i32, i32, i32
  }
  func.func @transform_2(%arg0: i32) -> (i32, i32, i32) {
    %c0_i32 = arith.constant 0 : i32
    %c0_i32_0 = arith.constant 0 : i32
    %c0_i32_1 = arith.constant 0 : i32
    return %arg0, %c0_i32, %c0_i32_0 : i32, i32, i32
  }
  func.func @transform_3(%arg0: i32) -> (i32, i32, i32) {
    %c0_i32 = arith.constant 0 : i32
    %c0_i32_0 = arith.constant 0 : i32
    %c0_i32_1 = arith.constant 0 : i32
    return %arg0, %c0_i32, %c0_i32_0 : i32, i32, i32
  }
  func.func @transform_4(%arg0: i32) -> (i32, i32, i32) {
    %c0_i32 = arith.constant 0 : i32
    %c0_i32_0 = arith.constant 0 : i32
    %c0_i32_1 = arith.constant 0 : i32
    return %arg0, %c0_i32, %c0_i32_0 : i32, i32, i32
  }
  func.func @transform_5(%arg0: i32) -> (i32, i32, i32) {
    %c0_i32 = arith.constant 0 : i32
    %c0_i32_0 = arith.constant 0 : i32
    %c0_i32_1 = arith.constant 0 : i32
    %c0_i32_2 = arith.constant 0 : i32
    return %c0_i32, %c0_i32_0, %c0_i32_1 : i32, i32, i32
  }
  func.func @transform_6(%arg0: i32) -> (i32, i32) {
    %c0_i32 = arith.constant 0 : i32
    %c0_i32_0 = arith.constant 0 : i32
    %c0_i32_1 = arith.constant 0 : i32
    return %c0_i32, %c0_i32_0 : i32, i32
  }
  func.func @transform_7(%arg0: i32) -> (i32, i32, i32) {
    %c0_i32 = arith.constant 0 : i32
    %c0_i32_0 = arith.constant 0 : i32
    %c0_i32_1 = arith.constant 0 : i32
    %c0_i32_2 = arith.constant 0 : i32
    return %c0_i32, %c0_i32_0, %c0_i32_1 : i32, i32, i32
  }
  func.func @transform_8(%arg0: i32) -> (i32, i32, i32, i32) {
    %c0_i32 = arith.constant 0 : i32
    %c0_i32_0 = arith.constant 0 : i32
    %c0_i32_1 = arith.constant 0 : i32
    %c0_i32_2 = arith.constant 0 : i32
    %c0_i32_3 = arith.constant 0 : i32
    return %c0_i32, %c0_i32_0, %c0_i32_1, %c0_i32_2 : i32, i32, i32, i32
  }
  func.func @transform_9(%arg0: i32) -> (i32, i32, i32) {
    %c0_i32 = arith.constant 0 : i32
    %c0_i32_0 = arith.constant 0 : i32
    %c0_i32_1 = arith.constant 0 : i32
    return %arg0, %c0_i32, %c0_i32_0 : i32, i32, i32
  }
}

</mosaic_0001>

<bundles_post_ra>
// kernel: tpu_custom_call.1
= control target key start
LH: loop header
LB: loop body
LE: loop exit
PB: predicated region body
PF: predicated region fallthrough
CT: control target
= control target key end

     0   :  { %s3338_s0 = inlined_call_operand.vmem [shape: f32[4,24,6], index: 0, kind: input, shape index: {}]   ;;  %s3339_s1 = inlined_call_operand.vmem [shape: f32[4,8,6], index: 1, kind: input, shape index: {}]   ;;  %s3340_s2 = inlined_call_operand.hbm [shape: f32[4,24,24], index: 2, kind: input, shape index: {}]   ;;  %s3341_s3 = inlined_call_operand.vmem [shape: f32[4,24,8], index: 3, kind: input, shape index: {}]   ;;  %s3342_s4 = inlined_call_operand.hbm [shape: f32[4,8,24], index: 4, kind: input, shape index: {}]   ;;  %s3343_s5 = inlined_call_operand.vmem [shape: f32[2,6,32], index: 5, kind: input, shape index: {}]   ;;  %s3344_s6 = inlined_call_operand.hbm [shape: f32[32,32], index: 6, kind: input, shape index: {}]   ;;  %s3345_s7 = inlined_call_operand.vmem [shape: f32[10,32,32], index: 7, kind: input, shape index: {}]   ;;  %s3346_s8 = inlined_call_operand.vmem [shape: f32[2,4,1,32], index: 8, kind: input, shape index: {}]   ;;  %s3347_s9 = inlined_call_operand.hbm [shape: f32[4,24,32], index: 9, kind: output, shape index: {}]  }
   0x1   :  { %3359 = sst [smem:[#allocation18_spill]] %s3340_s2 }
   0x2   :  { %3360 = sst [smem:[#allocation19_spill]] %s3344_s6 }
   0x3   :  { %14 = vsyncpa [#allocation3], 0 }
   0x4   :  { %16 = vsyncpa [#allocation3 + $0x1], 0 }
   0x5   :  { %17 = vsyncpa [#allocation6], 0 }
   0x6   :  { %19 = vsyncpa [#allocation6 + $0x1], 0 }
   0x7   :  { %20 = vsyncpa [#allocation4], 0 }
   0x8   :  { %22 = vsyncpa [#allocation4 + $0x1], 0  ;;  %s2731_s30 = smov 0   ;;  %s2733_s10 = smov 0  }
   0x9   :  { %s2735_s11 = smov 0   ;;  %s2737_s12 = smov 0  }
   0xa LB: > { %3361 = sst [smem:[#allocation13_spill]] %s2657_s30  ;;  %s2752_s13 = sadd.s32 4294967295, %s2669_s12   ;;  %s2669_s12 = sphi %s2737_s12, %s3386_s12   ;;  %s2665_s11 = sphi %s2735_s11, %s3388_s11   ;;  %s2661_s10 = sphi %s2733_s10, %s3390_s10   ;;  %s2657_s30 = sphi %s2731_s30, %s3389_s30  }
   0xb   : > { %3362 = sst [smem:[#allocation14_spill]] %s2665_s11  ;;  %s2076_s14 = sadd.s32 4294967294, %s2669_s12  }
   0xc   : > { %p100_p0 = scmp.ne.s32.totalorder %s2661_s10, %s2657_s30  ;;  %p3353_p1 = scmp.eq.s32.totalorder %s2752_s13, 0 }
   0xd   : > { %p266_p3 = scmp.eq.s32.totalorder %s2076_s14, 3  ;;  %p2077_p5 = scmp.ge.s32.totalorder %s2669_s12, 1 }
   0xe   : > { %p2761_p4 = por %p3353_p1, %p100_p0  ;;  %p273_p7 = scmp.lt.s32.totalorder %s2669_s12, 5 }
   0xf   : > { %p2766_p6 = por %p266_p3, %p100_p0  ;;  %s2671_s18 = smov [#allocation7]  }
  0x10   : > { %s3363_s15 = scalar_select %p2761_p4, 1, 0 }
  0x11   : > { %s3364_s16 = scalar_select %p2766_p6, 1, 0 }
  0x12   : > { %p2771_p8 = pnand %p2077_p5, %p273_p7  ;;  %s288_s19 = sshll.u32 %s2671_s18, 4  ;;  %s289_s19 = int_to_ptr.vmem [resolvable:$true] %s288_s19 }
  0x13   : > { %3365 = sst [smem:[#allocation15_spill]] %s3364_s16  ;;  %s2784_s21 = sadd.s32 1, %s2669_s12  }
  0x14   : > { %s3366_s17 = scalar_select %p2771_p8, 1, 0 }
  0x15   : > { %p2451_p9 = pneg %p2771_p8  ;;  %3368 = sst [smem:[#allocation16_spill]] %s2784_s21 }
  0x16   : > { %s87_s22 = sadd.s32 1, %s2665_s11  ;;  %s84_s23 = ssub.s32 %s2669_s12, %s2784_s21 }
  0x17   : > { %p2779_p10 = pnand %p2451_p9, %p3353_p1  ;;  %s2526_s24 = scalar_lea.vmem %s289_s19, 512 }
  0x18   : > { %p2527_p12 = scmp.ne.s32.totalorder %s289_s19, %s2526_s24  ;;  %p2534_p3 = scmp.lt.s32.totalorder %s289_s19, %s289_s19 }
  0x19   : > { %p2517_p11 = pneg %p2779_p10  ;;  %p2535_p5 = scmp.lt.s32.totalorder %s2526_s24, %s2526_s24 }
  0x1b   : > { %p2529_p13 = pnand %p2527_p12, %p2517_p11  ;;  %p2536_p7 = por %p2535_p5, %p2534_p3 }
  0x1d   : > { %p2530_p0 = pneg %p2529_p13 }
  0x1f   : > { %p2537_p2 = pnand %p2536_p7, %p2530_p0 }
  0x21   : > { %2540 = shalt.err (!%p2537_p2)
}
  0x22   : > { %s3348_s25 = smov 128   ;;  %s3349_s26 = smov 8  }
  0x23   : > { %s3369_s6 = sld [smem:[#allocation19_spill]]  ;;  %p85_p2 = scmp.eq.s32.totalorder %s84_s23, 0 }
  0x24   : > { %p94_p9 = scmp.ne.s32.totalorder %s2665_s11, %s2661_s10  ;;  %p95_p11 = scmp.eq.s32.totalorder %s2669_s12, 0 }
  0x25   : > { %p2467_p12 = scmp.lt.s32.totalorder %s2669_s12, 4  ;;  %p3371_p0 = scmp.eq.s32.totalorder %s2752_s13, 3 }
  0x26   : > { %s2804_s29 = scalar_select %p85_p2, %s2665_s11, %s87_s22  }
  0x27   : > { %p96_p13 = por %p95_p11, %p94_p9  ;;  %p2808_p3 = por %p3371_p0, %p94_p9 }
  0x28   : > { %3370 = sst [smem:[#allocation17_spill]] %s2804_s29  ;;  %s2813_s18 = sand.u32 1, %s2665_s11  }
  0x29   : > { %2454 = dma.hbm_to_vmem [thread:$0]  (!%p2779_p10), %s3369_s6, 512, %s289_s19, [#allocation6], %s3348_s25, %s3348_s25, %s3349_s26  }
  0x2a   : > { %s3372_s14 = scalar_select %p2808_p3, 1, 0 }
  0x2b   : > { %s2437_s20 = smul.u32 384, %s2669_s12  ;;  %s3373_s2 = sld [smem:[#allocation18_spill]] }
  0x2c   : > { %s2436_s24 = smul.u32 24, %s2813_s18  ;;  %p2822_p10 = pnand %p2467_p12, %p96_p13 }
  0x2d   : > { %s324_s6 = scalar_lea.sflag [#allocation3], %s2813_s18 }
  0x2e   : > { %s327_s25 = scalar_lea.vmem [#allocation2], %s2436_s24  ;;  %p2543_p7 = pneg %p2822_p10 }
  0x2f   : > { %s334_s26 = sshll.u32 %s327_s25, 4  ;;  %s2827_s26 = int_to_ptr.vmem [resolvable:$true] %s334_s26 }
  0x31   : > { %s2820_s23 = scalar_lea.hbm %s3373_s2, %s2437_s20  ;;  %s2546_s19 = scalar_lea.hbm %s3373_s2, 1536 }
  0x32   : > { %s2541_s29 = scalar_lea.hbm %s2820_s23, 384  ;;  %p2547_p11 = scmp.lt.s32.totalorder %s2820_s23, %s3373_s2 }
  0x33   : > { %p2542_p5 = scmp.ne.s32.totalorder %s2820_s23, %s2541_s29  ;;  %p2548_p12 = scmp.lt.s32.totalorder %s2546_s19, %s2541_s29 }
  0x35   : > { %p2544_p2 = pnand %p2543_p7, %p2542_p5  ;;  %p2549_p13 = por %p2548_p12, %p2547_p11 }
  0x37   : > { %p2545_p9 = pneg %p2544_p2 }
  0x39   : > { %p2550_p0 = pnand %p2549_p13, %p2545_p9 }
  0x3b   : > { %2553 = shalt.err (!%p2550_p0)
}
  0x3c   : > { %s2554_s25 = scalar_lea.vmem %s2827_s26, 384  ;;  %s2674_s24 = smov [#allocation2]  }
  0x3d   : > { %p2555_p1 = scmp.ne.s32.totalorder %s2827_s26, %s2554_s25  ;;  %s2559_s20 = sshll.u32 %s2674_s24, 4  ;;  %s2560_s20 = int_to_ptr.vmem [resolvable:$false] %s2559_s20 }
  0x3e   : > { %s2561_s27 = scalar_lea.vmem %s2560_s20, 768  ;;  %p2562_p6 = scmp.lt.s32.totalorder %s2827_s26, %s2560_s20 }
  0x3f   : > { %p2557_p5 = pnand %p2555_p1, %p2543_p7  ;;  %p2563_p3 = scmp.lt.s32.totalorder %s2561_s27, %s2554_s25 }
  0x41   : > { %p2558_p2 = pneg %p2557_p5  ;;  %p2564_p4 = por %p2563_p3, %p2562_p6 }
  0x43   : > { %p2565_p11 = pnand %p2564_p4, %p2558_p2 }
  0x45   : > { %2568 = shalt.err (!%p2565_p11)
}
  0x46   : > { %s3375_s11 = smov 8   ;;  %s3376_s21 = smov 128  }
  0x47   : > { %2458 = dma.hbm_to_vmem [thread:$0]  (!%p2822_p10), %s2820_s23, 384, %s2827_s26, %s324_s6, %s3376_s21, %s3376_s21, %s3375_s11  }
  0x48   : > { %s2081_s29 = sshll.u32 %s2813_s18, 3  ;;  %s2082_s19 = sshll.u32 %s2669_s12, 7 }
  0x49   : > { %s2864_s20 = scalar_lea.hbm %s3342_s4, %s2082_s19  ;;  %s356_s27 = scalar_lea.vmem [#allocation5], %s2081_s29 }
  0x4a   : > { %s363_s28 = sshll.u32 %s356_s27, 4  ;;  %s3377_s2 = sand.u32 1, %s2669_s12   ;;  %s364_s28 = int_to_ptr.vmem [resolvable:$true] %s363_s28 }
  0x4b   : > { %s353_s16 = scalar_lea.sflag [#allocation6], %s3377_s2  ;;  %s2569_s30 = scalar_lea.hbm %s2864_s20, 128 }
  0x4c   : > { %p2570_p1 = scmp.ne.s32.totalorder %s2864_s20, %s2569_s30  ;;  %s2574_s18 = scalar_lea.hbm %s3342_s4, 512 }
  0x4d   : > { %p2575_p3 = scmp.lt.s32.totalorder %s2864_s20, %s3342_s4  ;;  %p2576_p9 = scmp.lt.s32.totalorder %s2574_s18, %s2569_s30 }
  0x4e   : > { %p2572_p4 = pnand %p2570_p1, %p2543_p7 }
  0x4f   : > { %p2577_p12 = por %p2576_p9, %p2575_p3 }
  0x50   : > { %p2573_p6 = pneg %p2572_p4 }
  0x52   : > { %p2578_p13 = pnand %p2577_p12, %p2573_p6 }
  0x54   : > { %2581 = shalt.err (!%p2578_p13)
}
  0x55   : > { %s2582_s21 = scalar_lea.vmem %s364_s28, 128  ;;  %s2675_s2 = smov [#allocation5]  }
  0x56   : > { %p2583_p0 = scmp.ne.s32.totalorder %s364_s28, %s2582_s21  ;;  %s2587_s29 = sshll.u32 %s2675_s2, 4  ;;  %s2588_s29 = int_to_ptr.vmem [resolvable:$false] %s2587_s29 }
  0x57   : > { %s2589_s19 = scalar_lea.vmem %s2588_s29, 256  ;;  %p2590_p11 = scmp.lt.s32.totalorder %s364_s28, %s2588_s29 }
  0x58   : > { %p2585_p5 = pnand %p2583_p0, %p2543_p7  ;;  %p2591_p1 = scmp.lt.s32.totalorder %s2589_s19, %s2582_s21 }
  0x5a   : > { %p2586_p2 = pneg %p2585_p5  ;;  %p2592_p4 = por %p2591_p1, %p2590_p11 }
  0x5c   : > { %p2593_p8 = pnand %p2592_p4, %p2586_p2 }
  0x5e   : > { %2596 = shalt.err (!%p2593_p8)
}
  0x5f   : > { %2461 = dma.hbm_to_vmem [thread:$0]  (!%p2822_p10), %s2864_s20, 128, %s364_s28, %s353_s16  }
  0x60   : > { %p3378_p6 = scmp.ne.s32.totalorder %s3366_s17, 0 }
  0x61   : > { %s2889_s30 = sand.u32 (!%p3378_p6), 1, %s2661_s10   ;;  %p3379_p8 = scmp.ne.s32.totalorder (!%p3378_p6), %s3363_s15, 0 }
  0x62   : > { %372 = sbr.rel (%p3378_p6) target bundleno = 1425 (0x591), region = 56  ;;  %s375_s24 = scalar_lea.sflag (!%p3378_p6), [#allocation3], %s2889_s30 }
  0x63   : > { %s2438_s25 = smul.u32 (!%p3378_p6), 24, %s2889_s30 }
  0x65   : > { %s2895_s27 = scalar_lea.vmem (!%p3378_p6), [#allocation2], %s2438_s25 }
  0x67   : > { %2640 = dma.done.wait (%p3379_p8), %s375_s24, 384  }
  0x68   : > { %2642 = vsyncadd (%p3379_p8), %s375_s24, 4294966912  ;;  %s383_s16 = sand.u32 1, %s2752_s13   ;;  %s2084_s17 = sshll.u32 %s2889_s30, 3 }
  0x69   : > { %s384_s22 = scalar_lea.sflag [#allocation6], %s383_s16  ;;  %s2903_s28 = scalar_lea.vmem [#allocation5], %s2084_s17 }
  0x6a   : > { %2644 = dma.done.wait (%p3379_p8), %s384_s22, 128  }
  0x6b   : > { %2646 = vsyncadd (%p3379_p8), %s384_s22, 4294967168  ;;  %p3380_p10 = scmp.eq.s32.totalorder %s2752_s13, 0 }
  0x6d   : > { %2648 = dma.done.wait (%p3380_p10), [#allocation6], 512   ;;  %p3381_p7 = pmov %p3380_p10 }
  0x6e   : > { %p445_p3 = scmp.lt.s32.totalorder %s2752_s13, 3  ;;  %v2676_v0 = vmov 0.0   ;;  %vm2677_vm0 = vmmov 0   ;;  %vm485_vm1 = vcmask 1045504   ;;  %vm475_vm2 = vcmask 48128   ;;  %v2099_v7 = vld [vmem:[%s3345_s7 + $0x38] sm:$0xff] }
  0x6f   : > { %2650 = vsyncadd (%p3381_p7), [#allocation6], 4294966784  ;;  %2245 = vmatprep.subr.mxu0 %v2676_v0  ;;  %2434 = vmatprep.subr.mxu1 %v2676_v0  ;;  %v474_v1 = vld [vmem:[%s3343_s5] sm:$0x3f]  ;;  %v2093_v4 = vld [vmem:[%s3343_s5 + $0x8] sm:$0x3f] }
  0x70   : > { %2247 = vmatprep.mubr.msk.f32.mxu0 %vm2677_vm0, %v2676_v0  ;;  %2253 = vmatprep.mubr.msk.f32.mxu1 %vm2677_vm0, %v2676_v0  ;;  %s2921_s15 = scalar_select %p445_p3, %s2752_s13, 3  ;;  %v2098_v8 = vld [vmem:[%s3345_s7 + $0x30] sm:$0xff]  ;;  %v2097_v9 = vld [vmem:[%s3345_s7 + $0x28] sm:$0xff]  ;;  %v2096_v10 = vld [vmem:[%s3345_s7 + $0x20] sm:$0xff]  ;;  %vm761_vm3 = vcmask 261120   ;;  %vm671_vm4 = vcmask 195584  }
  0x71   : > { %2246 = vmatpush3.msk.msra.mxu0 %vm485_vm1, %v474_v1  ;;  %2435 = vmatpush3.msk.msra.mxu1 %vm485_vm1, %v474_v1  ;;  %v472_v11 = vld [vmem:[#allocation7 + $0x10] sm:$0xff]  ;;  %v471_v17 = vld [vmem:[#allocation7 + $0x8] sm:$0xff]  ;;  %v473_v18 = vld [vmem:[#allocation7 + $0x18] sm:$0xff]  ;;  %vm835_vm5 = vcmask 64512   ;;  %s2440_s16 = smul.u32 384, %s2752_s13  ;;  %s444_s17 = scalar_lea.vmem [#allocation8], %s2438_s25 }
  0x72   : > { %s2439_s20 = smul.u32 24, %s2921_s15  ;;  %s2087_s6 = sshll.u32 %s2921_s15, 3  ;;  %2256 = vmatprep.subr.mxu1 %v2676_v0  ;;  %2276 = vmatprep.subr.mxu0 %v2676_v0  ;;  %v470_v19 = vld [vmem:[#allocation7] sm:$0xff]  ;;  %v650_v28 = vld [vmem:[%s3345_s7 + $0x18] sm:$0xff]  ;;  %v649_v29 = vld [vmem:[%s3345_s7 + $0x10] sm:$0xff] }
  0x73   : > { %s453_s19 = scalar_lea.vmem %s3339_s1, %s2087_s6  ;;  %v2987_v27 = vld [vmem:[%s2895_s27] sm:$0xff]  ;;  %v3005_v30 = vld [vmem:[%s2895_s27 + $0x8] sm:$0xff]  ;;  %v3014_v31 = vld [vmem:[%s2895_s27 + $0x10] sm:$0xff]  ;;  %s1935_s22 = sshll.u32 %s444_s17, 4  ;;  %s3293_s22 = int_to_ptr.vmem [resolvable:$true] %s1935_s22 }
  0x74   : > { %s449_s23 = scalar_lea.vmem %s3338_s0, %s2439_s20  ;;  %v462_v6 = vld [vmem:[%s453_s19] sm:$0xff]  ;;  %v648_v32 = vld [vmem:[%s3345_s7 + $0x8] sm:$0xff]  ;;  %s458_s18 = scalar_lea.vmem %s3341_s3, %s2439_s20  ;;  %v2103_v36 = vld [vmem:[%s3345_s7 + $0x58] sm:$0xff] }
  0x75   : > { %v459_v2 = vld [vmem:[%s449_s23] sm:$0xff]  ;;  %v461_v3 = vld [vmem:[%s449_s23 + $0x10] sm:$0xff]  ;;  %v460_v5 = vld [vmem:[%s449_s23 + $0x8] sm:$0xff]  ;;  %s3291_s27 = scalar_lea.hbm %s3347_s9, %s2440_s16  ;;  %s1922_s13 = scalar_lea.sflag [#allocation4], %s2889_s30 }
  0x76   : > { %2248 = vmatmul.mubr.msk.f32.vlgmr.msra.gmra.mxu0 %vm475_vm2, %v459_v2  ;;  %2254 = vmatmul.mubr.msk.f32.vlgmr.msra.gmra.mxu1 %vm475_vm2, %v461_v3  ;;  %v647_v33 = vld [vmem:[%s3345_s7] sm:$0xff]  ;;  %v3043_v39 = vld [vmem:[%s458_s18 + $0x8] sm:$0xff]  ;;  %v2102_v41 = vld [vmem:[%s3345_s7 + $0x50] sm:$0xff]  ;;  %s2597_s25 = scalar_lea.vmem %s3293_s22, 384  ;;  %p3382_p12 = scmp.ne.s32.totalorder %s3372_s14, 0 }
  0x77   : > { %2250 = vmatprep.mubr.msk.f32.mxu0 %vm2677_vm0, %v2676_v0  ;;  %2257 = vmatpush3.msk.msra.mxu1 %vm485_vm1, %v2093_v4  ;;  %v3033_v34 = vld [vmem:[%s458_s18] sm:$0xff]  ;;  %v3059_v43 = vld [vmem:[%s458_s18 + $0x10] sm:$0xff]  ;;  %v2101_v44 = vld [vmem:[%s3345_s7 + $0x48] sm:$0xff]  ;;  %p2598_p9 = scmp.ne.s32.totalorder %s3293_s22, %s2597_s25  ;;  %s2678_s26 = smov [#allocation8]  }
  0x78   : > { %2258 = vmatprep.mubr.msk.f32.mxu1 %vm2677_vm0, %v2676_v0  ;;  %2261 = vmatprep.subr.mxu1 %v2676_v0  ;;  %v2100_v46 = vld [vmem:[%s3345_s7 + $0x40] sm:$0xff]  ;;  %v469_v49 = vld [vmem:[%s2903_s28] sm:$0xff]  ;;  %v2109_v52 = vld [vmem:[%s3345_s7 + $0x88] sm:$0xff]  ;;  %s2601_s18 = sshll.u32 %s2678_s26, 4  ;;  %s2602_s18 = int_to_ptr.vmem [resolvable:$false] %s2601_s18 }
  0x79   : > { %2277 = vmatpush3.msra.mxu0 %v2099_v7  ;;  %v2111_v50 = vld [vmem:[%s3345_s7 + $0x98] sm:$0xff]  ;;  %v2110_v51 = vld [vmem:[%s3345_s7 + $0x90] sm:$0xff]  ;;  %v2108_v53 = vld [vmem:[%s3345_s7 + $0x80] sm:$0xff]  ;;  %p2599_p13 = pnand %p2598_p9, %p3382_p12  ;;  %s2603_s23 = scalar_lea.vmem %s2602_s18, 768 }
  0x7a   : > { %2251 = vmatmul.mubr.msk.f32.gmra.mxu0 %vm475_vm2, %v460_v5  ;;  %2259 = vmatmul.mubr.msk.f32.vlgmr.msra.gmra.mxu1 %vm475_vm2, %v462_v6  ;;  %v2107_v54 = vld [vmem:[%s3345_s7 + $0x78] sm:$0xff]  ;;  %v2106_v55 = vld [vmem:[%s3345_s7 + $0x70] sm:$0xff]  ;;  %v2105_v56 = vld [vmem:[%s3345_s7 + $0x68] sm:$0xff]  ;;  %p2604_p5 = scmp.lt.s32.totalorder %s3293_s22, %s2602_s18  ;;  %p2605_p2 = scmp.lt.s32.totalorder %s2603_s23, %s2597_s25 }
  0x7b   : > { %2284 = vmatprep.mubr.msk.f32.mxu0 %vm2677_vm0, %v2676_v0  ;;  %2267 = vmatprep.mubr.msk.f32.mxu1 %vm2677_vm0, %v2676_v0  ;;  %v2104_v57 = vld [vmem:[%s3345_s7 + $0x60] sm:$0xff]  ;;  %p2600_p0 = pneg %p2599_p13 }
  0x7c   : > { %2278 = vmatprep.subr.mxu0 %v2676_v0  ;;  %p2606_p11 = por %p2605_p2, %p2604_p5 }
  0x7d   : > { %2279 = vmatpush3.msra.mxu0 %v2098_v8 }
  0x7e   : > { %2280 = vmatprep.subr.mxu0 %v2676_v0  ;;  %p2607_p1 = pnand %p2606_p11, %p2600_p0 }
  0x7f   : > { %2281 = vmatpush3.msra.mxu0 %v2097_v9 }
  0x80   : > { %2282 = vmatprep.subr.mxu0 %v2676_v0 }
  0x81   : > { %2283 = vmatpush3.msra.mxu0 %v2096_v10 }
  0x82   : > { %2287 = vmatprep.subr.mxu0 %v2676_v0 }
 0x136   : > { %v555_v12 = vpop.f32.mrf.mxu0  ;;  %v565_v13 = vpop.f32.mrf.mxu1 }
 0x137   : > { %v2973_v14 = vadd.f32 %v565_v13, %v472_v11  ;;  %v2981_v26 = vadd.f32 %v555_v12, %v470_v19 }
 0x138   : > { %v2249_v15 = vpop.f32.mrf.mxu0  ;;  %v2255_v16 = vpop.f32.mrf.mxu1 }
 0x139   : > { %2262 = vmatpush3.msra.mxu1 %v2973_v14 }
 0x13a   : > { %v560_v20 = vpop.f32.mrf.mxu0  ;;  %v643_v21 = vpop.f32.mrf.mxu1  ;;  %2263 = vmatprep.subr.mxu1 %v2676_v0 }
 0x13b   : > { %v2977_v22 = vadd.f32 %v560_v20, %v471_v17  ;;  %v2979_v23 = vadd.f32 %v643_v21, %v473_v18 }
 0x13c   : > { %v2252_v24 = vpop.f32.mrf.mxu0  ;;  %v2260_v25 = vpop.f32.mrf.mxu1 }
 0x13d   : > { %2264 = vmatpush3.msra.mxu1 %v2977_v22  ;;  %2285 = vmatmul.mubr.msk.f32.vlgmr.msra.gmra.mxu0 %vm761_vm3, %v2979_v23 }
 0x13e   : > { %2265 = vmatprep.subr.mxu1 %v2676_v0  ;;  %2289 = vmatprep.mubr.msk.f32.mxu0 %vm2677_vm0, %v2676_v0 }
 0x13f   : > { %2266 = vmatpush3.msra.mxu1 %v2981_v26 }
 0x140   : > { %2268 = vmatmul.mubr.msk.f32.vlgmr.msra.gmra.mxu1 %vm671_vm4, %v2987_v27  ;;  %2298 = vmatprep.subr.mxu1 %v2676_v0 }
 0x141   : > { %2270 = vmatprep.mubr.msk.f32.mxu1 %vm2677_vm0, %v2676_v0  ;;  %2299 = vmatpush3.msra.mxu1 %v650_v28 }
 0x142   : > { %2300 = vmatprep.subr.mxu1 %v2676_v0 }
 0x143   : > { %2301 = vmatpush3.msra.mxu1 %v649_v29 }
 0x144   : > { %2271 = vmatmul.mubr.msk.f32.gmra.mxu1 %vm671_vm4, %v3005_v30  ;;  %2302 = vmatprep.subr.mxu1 %v2676_v0 }
 0x145   : > { %2273 = vmatprep.mubr.msk.f32.mxu1 %vm2677_vm0, %v2676_v0  ;;  %2303 = vmatpush3.msra.mxu1 %v648_v32 }
 0x146   : > { %2304 = vmatprep.subr.mxu1 %v2676_v0 }
 0x147   : > { %2305 = vmatpush3.msra.mxu1 %v647_v33 }
 0x148   : > { %2274 = vmatmul.mubr.msk.f32.gmra.mxu1 %vm671_vm4, %v3014_v31  ;;  %2332 = vmatprep.subr.mxu1 %v2676_v0 }
 0x149   : > { %2306 = vmatprep.mubr.msk.f32.mxu1 %vm2677_vm0, %v2676_v0 }
 0x1fd   : > { %v831_v35 = vpop.f32.mrf.mxu0 }
 0x1fe   : > { %2288 = vmatpush3.msra.mxu0 %v831_v35 }
 0x1ff   : > { %2290 = vmatmul.mubr.msk.f32.vlgmr.msra.gmra.mxu0 %vm835_vm5, %v3033_v34  ;;  %2315 = vmatprep.subr.mxu0 %v2676_v0  ;;  %v2286_v37 = vpop.f32.mrf.mxu0 }
 0x200   : > { %v747_v38 = vpop.f32.mrf.mxu1  ;;  %2292 = vmatprep.mubr.msk.f32.mxu0 %vm2677_vm0, %v2676_v0  ;;  %2316 = vmatpush3.msra.mxu0 %v2103_v36 }
 0x201   : > { %2307 = vmatmul.mubr.msk.f32.vlgmr.msra.gmra.mxu1 %vm761_vm3, %v747_v38  ;;  %2317 = vmatprep.subr.mxu0 %v2676_v0 }
 0x202   : > { %2333 = vmatpush3.msra.mxu1 %v2973_v14  ;;  %v2269_v40 = vpop.f32.mrf.mxu1  ;;  %2309 = vmatprep.mubr.msk.f32.mxu1 %vm2677_vm0, %v2676_v0 }
 0x203   : > { %2334 = vmatprep.subr.mxu1 %v2676_v0  ;;  %2293 = vmatmul.mubr.msk.f32.gmra.mxu0 %vm835_vm5, %v3043_v39 }
 0x204   : > { %2335 = vmatpush3.msra.mxu1 %v2977_v22  ;;  %v752_v42 = vpop.f32.mrf.mxu1  ;;  %2295 = vmatprep.mubr.msk.f32.mxu0 %vm2677_vm0, %v2676_v0 }
 0x205   : > { %2336 = vmatprep.subr.mxu1 %v2676_v0  ;;  %2310 = vmatmul.mubr.msk.f32.gmra.mxu1 %vm761_vm3, %v752_v42 }
 0x206   : > { %2337 = vmatpush3.msra.mxu1 %v2981_v26  ;;  %v2272_v45 = vpop.f32.mrf.mxu1  ;;  %2318 = vmatpush3.msra.mxu0 %v2102_v41 }
 0x207   : > { %2296 = vmatmul.mubr.msk.f32.gmra.mxu0 %vm835_vm5, %v3059_v43  ;;  %2319 = vmatprep.subr.mxu0 %v2676_v0 }
 0x208   : > { %v757_v47 = vpop.f32.mrf.mxu1  ;;  %2312 = vmatprep.mubr.msk.f32.mxu1 %vm2677_vm0, %v2676_v0  ;;  %2320 = vmatpush3.msra.mxu0 %v2101_v44 }
 0x209   : > { %2313 = vmatmul.mubr.msk.f32.gmra.mxu1 %vm761_vm3, %v757_v47  ;;  %2321 = vmatprep.subr.mxu0 %v2676_v0 }
 0x20a   : > { %v2275_v48 = vpop.f32.mrf.mxu1  ;;  %2322 = vmatpush3.msra.mxu0 %v2100_v46  ;;  %2323 = vmatprep.mubr.msk.f32.mxu0 %vm2677_vm0, %v2676_v0 }
 0x20b   : > { %2324 = vmatmul.mubr.msk.f32.vlgmr.msra.gmra.mxu0 %vm761_vm3, %v2981_v26  ;;  %2338 = vmatprep.mubr.msk.f32.mxu1 %vm2677_vm0, %v2676_v0 }
 0x20c   : > { %2341 = vmatprep.subr.mxu1 %v2676_v0  ;;  %2326 = vmatprep.mubr.msk.f32.mxu0 %vm2677_vm0, %v2676_v0 }
 0x20d   : > { %2339 = vmatmul.mubr.msk.f32.vlgmr.msra.gmra.mxu1 %vm671_vm4, %v469_v49  ;;  %2352 = vmatprep.subr.mxu0 %v2676_v0 }
 0x20e   : > { %2342 = vmatpush3.msra.mxu1 %v2111_v50  ;;  %2349 = vmatprep.mubr.msk.f32.mxu1 %vm2677_vm0, %v2676_v0 }
 0x20f   : > { %2343 = vmatprep.subr.mxu1 %v2676_v0  ;;  %2327 = vmatmul.mubr.msk.f32.gmra.mxu0 %vm761_vm3, %v2977_v22 }
 0x210   : > { %2344 = vmatpush3.msra.mxu1 %v2110_v51  ;;  %2329 = vmatprep.mubr.msk.f32.mxu0 %vm2677_vm0, %v2676_v0 }
 0x211   : > { %2345 = vmatprep.subr.mxu1 %v2676_v0  ;;  %2353 = vmatpush3.msra.mxu0 %v2107_v54 }
 0x212   : > { %2346 = vmatpush3.msra.mxu1 %v2109_v52  ;;  %2354 = vmatprep.subr.mxu0 %v2676_v0 }
 0x213   : > { %2347 = vmatprep.subr.mxu1 %v2676_v0  ;;  %2330 = vmatmul.mubr.msk.f32.gmra.mxu0 %vm761_vm3, %v2973_v14 }
 0x214   : > { %2348 = vmatpush3.msra.mxu1 %v2108_v53  ;;  %2360 = vmatprep.mubr.msk.f32.mxu0 %vm2677_vm0, %v2676_v0 }
 0x215   : > { %2350 = vmatmul.mubr.msk.f32.vlgmr.msra.gmra.mxu1 %vm761_vm3, %v2979_v23  ;;  %2363 = vmatprep.subr.mxu1 %v2676_v0 }
 0x216   : > { %2369 = vmatprep.mubr.msk.f32.mxu1 %vm2677_vm0, %v2676_v0  ;;  %2355 = vmatpush3.msra.mxu0 %v2106_v55 }
 0x217   : > { %2356 = vmatprep.subr.mxu0 %v2676_v0 }
 0x218   : > { %2357 = vmatpush3.msra.mxu0 %v2105_v56 }
 0x219   : > { %2358 = vmatprep.subr.mxu0 %v2676_v0 }
 0x21a   : > { %2359 = vmatpush3.msra.mxu0 %v2104_v57 }
 0x21b   : > { %2378 = vmatprep.subr.mxu0 %v2676_v0 }
 0x2bf   : > { %v911_v58 = vpop.f32.mrf.mxu0 }
 0x2c1   : > { %v2291_v59 = vpop.f32.mrf.mxu0  ;;  %v1000_v60 = vpop.f32.mrf.mxu1 }
 0x2c2   : > { %v1001_v8 = vadd.f32 %v1000_v60, %v911_v58 }
 0x2c3   : > { %v916_v61 = vpop.f32.mrf.mxu0  ;;  %v2308_v62 = vpop.f32.mrf.mxu1 }
 0x2c5   : > { %v2294_v63 = vpop.f32.mrf.mxu0  ;;  %v1005_v1 = vpop.f32.mrf.mxu1 }
 0x2c6   : > { %v1006_v11 = vadd.f32 %v1005_v1, %v916_v61  ;;  %v2129_v63 = vld [vmem:[%s3346_s8] ss:$0 sm:$0xff] }
 0x2c7   : > { %v921_v2 = vpop.f32.mrf.mxu0  ;;  %v2311_v3 = vpop.f32.mrf.mxu1 }
 0x2c9   : > { %v2297_v4 = vpop.f32.mrf.mxu0  ;;  %v1010_v5 = vpop.f32.mrf.mxu1 }
 0x2ca   : > { %v1011_v17 = vadd.f32 %v1010_v5, %v921_v2  ;;  %v2130_v4 = vld [vmem:[%s3346_s8 + $0x1] ss:$0 sm:$0xff] }
 0x2cb   : > { %v2314_v6 = vpop.f32.mrf.mxu1  ;;  %v1089_v7 = vpop.f32.mrf.mxu0 }
 0x2cc   : > { %v1103_v12 = vadd.f32 %v1089_v7, %v1001_v8 }
 0x2cd   : > { %v2325_v9 = vpop.f32.mrf.mxu0  ;;  %v1175_v10 = vpop.f32.mrf.mxu1 }
 0x2ce   : > { %2361 = vmatmul.mubr.msk.f32.vlgmr.msra.gmra.mxu0 %vm761_vm3, %v1175_v10  ;;  %v1338_v18 = vmul.f32 %v1103_v12, %v1103_v12  ;;  %v1325_v22 = vsel %vm761_vm3, %v1103_v12, 0.0 }
 0x2cf   : > { %v1094_v13 = vpop.f32.mrf.mxu0  ;;  %v2340_v14 = vpop.f32.mrf.mxu1  ;;  %2386 = vmatprep.mubr.msk.f32.mxu0 %vm2677_vm0, %v2676_v0 }
 0x2d0   : > { %v1104_v15 = vadd.f32 %v1094_v13, %v1006_v11  ;;  %v1341_v29 = vsel %vm761_vm3, %v1338_v18, 0.0  ;;  %v2139_v14 = vld [vmem:[%s3345_s7 + $0xc0] sm:$0xff] }
 0x2d1   : > { %v2328_v16 = vpop.f32.mrf.mxu0 }
 0x2d2   : > { %v1326_v19 = vsel %vm761_vm3, %v1104_v15, 0.0  ;;  %v1339_v20 = vmul.f32 %v1104_v15, %v1104_v15 }
 0x2d3   : > { %v1099_v21 = vpop.f32.mrf.mxu0  ;;  %v1327_v25 = vadd.f32 %v1326_v19, %v1325_v22 }
 0x2d4   : > { %v1342_v23 = vsel %vm761_vm3, %v1339_v20, 0.0  ;;  %v1105_v24 = vadd.f32 %v1099_v21, %v1011_v17 }
 0x2d5   : > { %v3141_v26 = vpop.f32.mrf.mxu1  ;;  %v2331_v28 = vpop.f32.mrf.mxu0  ;;  %v1343_v35 = vadd.f32 %v1342_v23, %v1341_v29 }
 0x2d6   : > { %v1328_v32 = vsel %vm761_vm3, %v1105_v24, 0.0  ;;  %v1340_v33 = vmul.f32 %v1105_v24, %v1105_v24 }
 0x2d7   : > { %v1329_v36 = vadd.f32 %v1328_v32, %v1327_v25  ;;  %v2351_v37 = vpop.f32.mrf.mxu1 }
 0x2d8   : > { %v1344_v38 = vsel %vm761_vm3, %v1340_v33, 0.0 }
 0x2d9   : > { %v1330_v40 = vrot.slane %v1329_v36, 4  ;;  %v1345_v41 = vadd.f32 %v1344_v38, %v1343_v35 }
 0x2db   : > { %v1331_v42 = vadd.f32 %v1330_v40, %v1329_v36  ;;  %v1346_v44 = vrot.slane %v1345_v41, 4 }
 0x2dd   : > { %v1332_v45 = vrot.slane %v1331_v42, 2  ;;  %v1347_v46 = vadd.f32 %v1346_v44, %v1345_v41 }
 0x2df   : > { %v1333_v47 = vadd.f32 %v1332_v45, %v1331_v42  ;;  %v1348_v48 = vrot.slane %v1347_v46, 2 }
 0x2e1   : > { %v1334_v49 = vrot.slane %v1333_v47, 1  ;;  %v1349_v50 = vadd.f32 %v1348_v48, %v1347_v46 }
 0x2e3   : > { %v1335_v51 = vadd.f32 %v1334_v49, %v1333_v47  ;;  %v1350_v52 = vrot.slane %v1349_v50, 1  ;;  %v2133_v47 = vld [vmem:[%s3346_s8 + $0x2] ss:$0 sm:$0xff]  ;;  %v2134_v49 = vld [vmem:[%s3346_s8 + $0x3] ss:$0 sm:$0xff] }
 0x2e5   : > { %v1337_v53 = vmul.f32 0.041666668, %v1335_v51  ;;  %v1351_v54 = vadd.f32 %v1350_v52, %v1349_v50 }
 0x2e7   : > { %v1352_v55 = vmul.f32 0.041666668, %v1351_v54  ;;  %v1353_v56 = vmul.f32 %v1337_v53, %v1337_v53  ;;  %v1357_v59 = vsub.f32 %v1105_v24, %v1337_v53  ;;  %v1356_v60 = vsub.f32 %v1104_v15, %v1337_v53  ;;  %v2138_v15 = vld [vmem:[%s3345_s7 + $0xb8] sm:$0xff]  ;;  %v2136_v54 = vld [vmem:[%s3345_s7 + $0xa8] sm:$0xff] }
 0x2e8   : > { %v1355_v61 = vsub.f32 %v1103_v12, %v1337_v53  ;;  %v2137_v53 = vld [vmem:[%s3345_s7 + $0xb0] sm:$0xff] }
 0x2e9   : > { %v1354_v57 = vsub.f32 %v1352_v55, %v1353_v56  ;;  %v2135_v55 = vld [vmem:[%s3345_s7 + $0xa0] sm:$0xff] }
 0x2eb   : > { %v1358_v58 = vadd.f32 1e-05, %v1354_v57 }
 0x2ed   : > { %2509 = vrsqrt.f32 %v1358_v58 }
 0x2fa   : > { %v2510_v62 = vpop.eup %2509 }
 0x2fb   : > { %v1362_v1 = vmul.f32 %v2510_v62, %v1357_v59  ;;  %v1361_v2 = vmul.f32 %v2510_v62, %v1356_v60  ;;  %v1360_v3 = vmul.f32 %v2510_v62, %v1355_v61 }
 0x2fd   : > { %v1371_v5 = vmul.f32 %v2129_v63, %v1362_v1  ;;  %v1370_v6 = vmul.f32 %v2129_v63, %v1361_v2  ;;  %v1369_v7 = vmul.f32 %v2129_v63, %v1360_v3  ;;  %v2146_v63 = vld [vmem:[%s3345_s7 + $0xf8] sm:$0xff]  ;;  %v2145_v2 = vld [vmem:[%s3345_s7 + $0xf0] sm:$0xff]  ;;  %v2144_v3 = vld [vmem:[%s3345_s7 + $0xe8] sm:$0xff] }
 0x2ff   : > { %v3152_v8 = vadd.f32 %v2130_v4, %v1371_v5  ;;  %v3154_v9 = vadd.f32 %v2130_v4, %v1370_v6  ;;  %v3157_v11 = vadd.f32 %v2130_v4, %v1369_v7 }
 0x301   : > { %v1383_v10 = vmax.f32 %v3152_v8, 0.0  ;;  %v1382_v12 = vmax.f32 %v3154_v9, 0.0  ;;  %v1381_v13 = vmax.f32 %v3157_v11, 0.0 }
 0x303   : > { %2364 = vmatpush3.msra.mxu1 %v1383_v10 }
 0x304   : > { %2365 = vmatprep.subr.mxu1 %v2676_v0 }
 0x305   : > { %2366 = vmatpush3.msra.mxu1 %v1382_v12 }
 0x306   : > { %2367 = vmatprep.subr.mxu1 %v2676_v0 }
 0x307   : > { %2368 = vmatpush3.msra.mxu1 %v1381_v13 }
 0x308   : > { %2370 = vmatmul.mubr.msk.f32.vlgmr.msra.gmra.mxu1 %vm671_vm4, %v2987_v27  ;;  %2400 = vmatprep.subr.mxu1 %v2676_v0  ;;  %v2142_v27 = vld [vmem:[%s3345_s7 + $0xd8] sm:$0xff] }
 0x309   : > { %2372 = vmatprep.mubr.msk.f32.mxu1 %vm2677_vm0, %v2676_v0  ;;  %2379 = vmatpush3.msra.mxu0 %v2142_v27 }
 0x30a   : > { %2380 = vmatprep.subr.mxu0 %v2676_v0  ;;  %2401 = vmatpush3.msra.mxu1 %v2138_v15 }
 0x30b   : > { %2402 = vmatprep.subr.mxu1 %v2676_v0 }
 0x30c   : > { %2373 = vmatmul.mubr.msk.f32.gmra.mxu1 %vm671_vm4, %v3005_v30  ;;  %v2141_v30 = vld [vmem:[%s3345_s7 + $0xd0] sm:$0xff] }
 0x30d   : > { %2375 = vmatprep.mubr.msk.f32.mxu1 %vm2677_vm0, %v2676_v0  ;;  %2381 = vmatpush3.msra.mxu0 %v2141_v30 }
 0x30e   : > { %2382 = vmatprep.subr.mxu0 %v2676_v0  ;;  %2403 = vmatpush3.msra.mxu1 %v2137_v53 }
 0x30f   : > { %2404 = vmatprep.subr.mxu1 %v2676_v0 }
 0x310   : > { %2376 = vmatmul.mubr.msk.f32.gmra.mxu1 %vm671_vm4, %v3014_v31  ;;  %v2140_v31 = vld [vmem:[%s3345_s7 + $0xc8] sm:$0xff] }
 0x311   : > { %2408 = vmatprep.mubr.msk.f32.mxu1 %vm2677_vm0, %v2676_v0  ;;  %2383 = vmatpush3.msra.mxu0 %v2140_v31 }
 0x312   : > { %2384 = vmatprep.subr.mxu0 %v2676_v0  ;;  %2405 = vmatpush3.msra.mxu1 %v2136_v54 }
 0x313   : > { %2385 = vmatpush3.msra.mxu0 %v2139_v14  ;;  %2406 = vmatprep.subr.mxu1 %v2676_v0 }
 0x314   : > { %2389 = vmatprep.subr.mxu0 %v2676_v0  ;;  %2407 = vmatpush3.msra.mxu1 %v2135_v55 }
 0x38e   : > { %v1318_v16 = vpop.f32.mrf.mxu0 }
 0x38f   : > { %v1319_v17 = vadd.f32 %v1318_v16, %v3141_v26 }
 0x390   : > { %v2362_v18 = vpop.f32.mrf.mxu0 }
 0x391   : > { %v1388_v19 = vsel %vm761_vm3, %v1319_v17, 0.0  ;;  %v1397_v20 = vmul.f32 %v1319_v17, %v1319_v17 }
 0x392   : > { %v1389_v21 = vrot.slane %v1388_v19, 4 }
 0x393   : > { %v1398_v22 = vsel %vm761_vm3, %v1397_v20, 0.0 }
 0x394   : > { %v1390_v23 = vadd.f32 %v1389_v21, %v1388_v19  ;;  %v1399_v24 = vrot.slane %v1398_v22, 4 }
 0x396   : > { %v1391_v25 = vrot.slane %v1390_v23, 2  ;;  %v1400_v28 = vadd.f32 %v1399_v24, %v1398_v22 }
 0x398   : > { %v1392_v29 = vadd.f32 %v1391_v25, %v1390_v23  ;;  %v1401_v32 = vrot.slane %v1400_v28, 2 }
 0x39a   : > { %v1393_v33 = vrot.slane %v1392_v29, 1  ;;  %v1402_v35 = vadd.f32 %v1401_v32, %v1400_v28 }
 0x39c   : > { %v1394_v36 = vadd.f32 %v1393_v33, %v1392_v29  ;;  %v1403_v37 = vrot.slane %v1402_v35, 1 }
 0x39e   : > { %v1396_v38 = vmul.f32 0.125, %v1394_v36  ;;  %v1404_v40 = vadd.f32 %v1403_v37, %v1402_v35 }
 0x3a0   : > { %v1405_v26 = vmul.f32 0.125, %v1404_v40  ;;  %v1406_v41 = vmul.f32 %v1396_v38, %v1396_v38  ;;  %v1408_v45 = vsub.f32 %v1319_v17, %v1396_v38 }
 0x3a2   : > { %v1407_v42 = vsub.f32 %v1405_v26, %v1406_v41 }
 0x3a4   : > { %v1409_v44 = vadd.f32 1e-05, %v1407_v42 }
 0x3a6   : > { %2511 = vrsqrt.f32 %v1409_v44 }
 0x3b3   : > { %v2512_v46 = vpop.eup %2511 }
 0x3b4   : > { %v1411_v48 = vmul.f32 %v2512_v46, %v1408_v45 }
 0x3b6   : > { %v1418_v50 = vmul.f32 %v2133_v47, %v1411_v48 }
 0x3b8   : > { %v1425_v51 = vadd.f32 %v2134_v49, %v1418_v50 }
 0x3ba   : > { %v1426_v52 = vmax.f32 %v1425_v51, 0.0 }
 0x3bc   : > { %2387 = vmatmul.mubr.msk.f32.vlgmr.msra.gmra.mxu0 %vm761_vm3, %v1426_v52 }
 0x3bd   : > { %2391 = vmatprep.mubr.msk.f32.mxu0 %vm2677_vm0, %v2676_v0 }
 0x3c8   : > { %v1508_v56 = vpop.f32.mrf.mxu1 }
 0x3c9   : > { %2409 = vmatmul.mubr.msk.f32.vlgmr.msra.gmra.mxu1 %vm761_vm3, %v1508_v56 }
 0x3ca   : > { %v2371_v57 = vpop.f32.mrf.mxu1  ;;  %2411 = vmatprep.mubr.msk.f32.mxu1 %vm2677_vm0, %v2676_v0 }
 0x3cc   : > { %v1513_v58 = vpop.f32.mrf.mxu1 }
 0x3cd   : > { %2412 = vmatmul.mubr.msk.f32.gmra.mxu1 %vm761_vm3, %v1513_v58 }
 0x3ce   : > { %v2374_v59 = vpop.f32.mrf.mxu1  ;;  %2414 = vmatprep.mubr.msk.f32.mxu1 %vm2677_vm0, %v2676_v0 }
 0x3d0   : > { %v1518_v60 = vpop.f32.mrf.mxu1 }
 0x3d1   : > { %2415 = vmatmul.mubr.msk.f32.gmra.mxu1 %vm761_vm3, %v1518_v60 }
 0x3d2   : > { %v2377_v61 = vpop.f32.mrf.mxu1 }
 0x47c   : > { %v1591_v62 = vpop.f32.mrf.mxu0 }
 0x47d   : > { %2390 = vmatpush3.msra.mxu0 %v1591_v62  ;;  %v2162_v62 = vld [vmem:[%s3346_s8 + $0x4] ss:$0 sm:$0xff] }
 0x47e   : > { %v2388_v1 = vpop.f32.mrf.mxu0  ;;  %2392 = vmatmul.mubr.msk.f32.vlgmr.msra.gmra.mxu0 %vm835_vm5, %v3033_v34  ;;  %2417 = vmatprep.subr.mxu0 %v2676_v0  ;;  %v2143_v34 = vld [vmem:[%s3345_s7 + $0xe0] sm:$0xff] }
 0x47f   : > { %2394 = vmatprep.mubr.msk.f32.mxu0 %vm2677_vm0, %v2676_v0  ;;  %2418 = vmatpush3.msra.mxu0 %v2146_v63 }
 0x480   : > { %2419 = vmatprep.subr.mxu0 %v2676_v0 }
 0x481   : > { %2420 = vmatpush3.msra.mxu0 %v2145_v2 }
 0x482   : > { %2395 = vmatmul.mubr.msk.f32.gmra.mxu0 %vm835_vm5, %v3043_v39  ;;  %2421 = vmatprep.subr.mxu0 %v2676_v0 }
 0x483   : > { %2397 = vmatprep.mubr.msk.f32.mxu0 %vm2677_vm0, %v2676_v0  ;;  %2422 = vmatpush3.msra.mxu0 %v2144_v3  ;;  %v2163_v3 = vld [vmem:[%s3346_s8 + $0x5] ss:$0 sm:$0xff] }
 0x484   : > { %2423 = vmatprep.subr.mxu0 %v2676_v0 }
 0x485   : > { %2424 = vmatpush3.msra.mxu0 %v2143_v34 }
 0x486   : > { %2398 = vmatmul.mubr.msk.f32.gmra.mxu0 %vm835_vm5, %v3059_v43 }
 0x487   : > { %2425 = vmatprep.mubr.msk.f32.mxu0 %vm2677_vm0, %v2676_v0 }
 0x489   : > { %v1750_v39 = vpop.f32.mrf.mxu1 }
 0x48a   : > { %2426 = vmatmul.mubr.msk.f32.vlgmr.msra.gmra.mxu0 %vm761_vm3, %v1381_v13 }
 0x48b   : > { %2428 = vmatprep.mubr.msk.f32.mxu0 %vm2677_vm0, %v2676_v0  ;;  %v2410_v43 = vpop.f32.mrf.mxu1 }
 0x48d   : > { %v1755_v4 = vpop.f32.mrf.mxu1 }
 0x48e   : > { %2429 = vmatmul.mubr.msk.f32.gmra.mxu0 %vm761_vm3, %v1382_v12 }
 0x48f   : > { %2431 = vmatprep.mubr.msk.f32.mxu0 %vm2677_vm0, %v2676_v0  ;;  %v2413_v5 = vpop.f32.mrf.mxu1 }
 0x491   : > { %v1760_v6 = vpop.f32.mrf.mxu1 }
 0x492   : > { %2432 = vmatmul.mubr.msk.f32.gmra.mxu0 %vm761_vm3, %v1383_v10 }
 0x493   : > { %v2416_v7 = vpop.f32.mrf.mxu1 }
 0x53e   : > { %v1661_v11 = vpop.f32.mrf.mxu0 }
 0x53f   : > { %v1751_v14 = vadd.f32 %v1750_v39, %v1661_v11 }
 0x540   : > { %v2393_v13 = vpop.f32.mrf.mxu0 }
 0x542   : > { %v1666_v27 = vpop.f32.mrf.mxu0 }
 0x543   : > { %v1756_v0 = vadd.f32 %v1755_v4, %v1666_v27 }
 0x544   : > { %v2396_v30 = vpop.f32.mrf.mxu0 }
 0x546   : > { %v1671_v9 = vpop.f32.mrf.mxu0 }
 0x547   : > { %v1761_v18 = vadd.f32 %v1760_v6, %v1671_v9 }
 0x548   : > { %v2399_v31 = vpop.f32.mrf.mxu0 }
 0x54a   : > { %v1839_v12 = vpop.f32.mrf.mxu0 }
 0x54b   : > { %v1853_v16 = vadd.f32 %v1839_v12, %v1751_v14 }
 0x54c   : > { %v2427_v15 = vpop.f32.mrf.mxu0 }
 0x54d   : > { %v1872_v19 = vmul.f32 %v1853_v16, %v1853_v16  ;;  %v1860_v23 = vsel %vm761_vm3, %v1853_v16, 0.0 }
 0x54e   : > { %v1844_v8 = vpop.f32.mrf.mxu0 }
 0x54f   : > { %v1854_v17 = vadd.f32 %v1844_v8, %v1756_v0  ;;  %v1875_v32 = vsel %vm761_vm3, %v1872_v19, 0.0 }
 0x550   : > { %v2430_v10 = vpop.f32.mrf.mxu0 }
 0x551   : > { %v1861_v20 = vsel %vm761_vm3, %v1854_v17, 0.0  ;;  %v1873_v21 = vmul.f32 %v1854_v17, %v1854_v17 }
 0x552   : > { %v1849_v22 = vpop.f32.mrf.mxu0  ;;  %v1862_v28 = vadd.f32 %v1861_v20, %v1860_v23 }
 0x553   : > { %v1876_v24 = vsel %vm761_vm3, %v1873_v21, 0.0  ;;  %v1855_v25 = vadd.f32 %v1849_v22, %v1761_v18 }
 0x554   : > { %v2433_v29 = vpop.f32.mrf.mxu0  ;;  %v1877_v36 = vadd.f32 %v1876_v24, %v1875_v32 }
 0x555   : > { %v1863_v33 = vsel %vm761_vm3, %v1855_v25, 0.0  ;;  %v1874_v35 = vmul.f32 %v1855_v25, %v1855_v25 }
 0x556   : > { %v1864_v37 = vadd.f32 %v1863_v33, %v1862_v28 }
 0x557   : > { %v1878_v38 = vsel %vm761_vm3, %v1874_v35, 0.0 }
 0x558   : > { %v1865_v40 = vrot.slane %v1864_v37, 4  ;;  %v1879_v26 = vadd.f32 %v1878_v38, %v1877_v36 }
 0x55a   : > { %v1866_v41 = vadd.f32 %v1865_v40, %v1864_v37  ;;  %v1880_v42 = vrot.slane %v1879_v26, 4 }
 0x55c   : > { %v1867_v44 = vrot.slane %v1866_v41, 2  ;;  %v1881_v45 = vadd.f32 %v1880_v42, %v1879_v26 }
 0x55e   : > { %v1868_v46 = vadd.f32 %v1867_v44, %v1866_v41  ;;  %v1882_v47 = vrot.slane %v1881_v45, 2 }
 0x560   : > { %v1869_v48 = vrot.slane %v1868_v46, 1  ;;  %v1883_v49 = vadd.f32 %v1882_v47, %v1881_v45 }
 0x562   : > { %v1870_v50 = vadd.f32 %v1869_v48, %v1868_v46  ;;  %v1884_v51 = vrot.slane %v1883_v49, 1 }
 0x564   : > { %v1871_v52 = vmul.f32 0.041666668, %v1870_v50  ;;  %v1885_v53 = vadd.f32 %v1884_v51, %v1883_v49 }
 0x566   : > { %v1886_v54 = vmul.f32 0.041666668, %v1885_v53  ;;  %v1887_v55 = vmul.f32 %v1871_v52, %v1871_v52  ;;  %v1889_v58 = vsub.f32 %v1853_v16, %v1871_v52  ;;  %v1890_v59 = vsub.f32 %v1854_v17, %v1871_v52 }
 0x567   : > { %v1891_v60 = vsub.f32 %v1855_v25, %v1871_v52 }
 0x568   : > { %v1888_v56 = vsub.f32 %v1886_v54, %v1887_v55 }
 0x56a   : > { %v1892_v57 = vadd.f32 1e-05, %v1888_v56 }
 0x56c   : > { %2513 = vrsqrt.f32 %v1892_v57 }
 0x579   : > { %v2514_v61 = vpop.eup %2513 }
 0x57a   : > { %v1894_v63 = vmul.f32 %v2514_v61, %v1889_v58  ;;  %v1895_v1 = vmul.f32 %v2514_v61, %v1890_v59  ;;  %v1896_v2 = vmul.f32 %v2514_v61, %v1891_v60 }
 0x57c   : > { %v1903_v34 = vmul.f32 %v2162_v62, %v1894_v63  ;;  %v1904_v39 = vmul.f32 %v2162_v62, %v1895_v1  ;;  %v1905_v43 = vmul.f32 %v2162_v62, %v1896_v2 }
 0x57e   : > { %v1912_v4 = vadd.f32 %v2163_v3, %v1903_v34  ;;  %v1913_v5 = vadd.f32 %v2163_v3, %v1904_v39  ;;  %v1914_v6 = vadd.f32 %v2163_v3, %v1905_v43 }
 0x580   : > { %v1915_v7 = vmax.f32 %v1912_v4, 0.0  ;;  %v1916_v11 = vmax.f32 %v1913_v5, 0.0  ;;  %v1917_v13 = vmax.f32 %v1914_v6, 0.0 }
 0x582   : > { %1920 = vst.msk [vmem:[%s444_s17 + $0x10] sm:$0xff] %vm761_vm3, %v1917_v13  ;;  %1918 = vst.msk [vmem:[%s444_s17] sm:$0xff] %vm761_vm3, %v1915_v7 }
 0x583   : > { %1919 = vst.msk [vmem:[%s444_s17 + $0x8] sm:$0xff] %vm761_vm3, %v1916_v11 }
 0x584   : > { %2610 = shalt.err (!%p2607_p1)
}
 0x585   : > { %s2611_s11 = scalar_lea.hbm %s3291_s27, 384  ;;  %s2615_s21 = scalar_lea.hbm %s3347_s9, 1536 }
 0x586   : > { %p2612_p4 = scmp.ne.s32.totalorder %s3291_s27, %s2611_s11  ;;  %p2616_p10 = scmp.lt.s32.totalorder %s3291_s27, %s3347_s9 }
 0x587   : > { %p2617_p7 = scmp.lt.s32.totalorder %s2615_s21, %s2611_s11 }
 0x588   : > { %p2613_p6 = pnand %p2612_p4, %p3382_p12 }
 0x589   : > { %p2618_p3 = por %p2617_p7, %p2616_p10 }
 0x58a   : > { %p2614_p8 = pneg %p2613_p6 }
 0x58c   : > { %p2619_p9 = pnand %p2618_p3, %p2614_p8 }
 0x58e   : > { %2622 = shalt.err (!%p2619_p9)
}
 0x58f   : > { %s2679_s19 = smov 128   ;;  %s2680_s24 = smov 8  }
 0x590   : > { %2449 = dma.vmem_to_hbm [thread:$0]  (%p3382_p12), %s3293_s22, 384, %s3291_s27, %s1922_s13, %s2679_s19, %s2679_s19, %s2680_s24  }
 0x591 PF: > { %s3383_s16 = sld [smem:[#allocation13_spill]]  ;;  %p2469_p13 = scmp.ge.s32.totalorder %s2669_s12, 2 }
 0x592   : > { %s3384_s17 = sld [smem:[#allocation15_spill]] }
 0x597   : > { %s1950_s28 = sand.u32 1, %s3383_s16  }
 0x598   : > { %p3385_p0 = scmp.ne.s32.totalorder %s3384_s17, 0  ;;  %s1951_s6 = scalar_lea.sflag [#allocation4], %s1950_s28 }
 0x59a   : > { %p2463_p5 = pnand %p2469_p13, %p3385_p0 }
 0x59c   : > { %p2464_p2 = pneg %p2463_p5 }
 0x59e   : > { %2652 = dma.done.wait (%p2464_p2), %s1951_s6, 384  }
 0x59f   : > { %2654 = vsyncadd (%p2464_p2), %s1951_s6, 4294966912  ;;  %s3386_s12 = sld [smem:[#allocation16_spill]]  ;;  %s3389_s30 = smov %s2661_s10 }
 0x5a0   : > { %s3387_s25 = sld [smem:[#allocation14_spill]] }
 0x5a1   : > { %s3388_s11 = sld [smem:[#allocation17_spill]] }
 0x5a5   : > { %p25_p11 = scmp.ge.s32.totalorder %s3386_s12, 6  }
 0x5a6   : > { %s3390_s10 = smov %s3387_s25 }
 0x5a7   :  { %27 = sbr.rel (!%p25_p11) target bundleno = 10 (0xa), region = 140 }
 0x5ac   :  { %1956 = vsyncpa [#allocation3], 1 }
 0x5ad   :  { %1958 = vsyncpa [#allocation3 + $0x1], 1 }
 0x5ae   :  { %1959 = vsyncpa [#allocation6], 1 }
 0x5af   :  { %1961 = vsyncpa [#allocation6 + $0x1], 1 }
 0x5b0   :  { %1962 = vsyncpa [#allocation4], 1 }
 0x5b1   :  { %1964 = vsyncpa [#allocation4 + $0x1], 1 }

</bundles_post_ra>
